<compile_context>
chip_gen: v6e
topology: v6e:2x2x1
jax: 0.10.0
libtpu: 0.0.40
codegen_flags: <defaults>
</compile_context>

<pallas_src>
import functools
import math

import jax
import jax.numpy as jnp
from jax.experimental import pallas as pl
from jax.experimental.pallas import tpu as pltpu


# ----------------------------- Pallas kernels ------------------------------

def _embed_pe_kernel(ids_ref, emb_ref, pe_ref, o_ref):
    """Fused embedding gather + positional-encoding add for one batch row.

    ids_ref: [B, S] int32 in SMEM (whole array)
    emb_ref: [V, 1, D] f32 in VMEM (whole table; leading-axis dynamic index)
    pe_ref : [S, D]    f32 in VMEM
    o_ref  : [S, D]    f32 (batch dim squeezed by BlockSpec)
    """
    b = pl.program_id(0)
    seq_len = o_ref.shape[0]
    rows = []
    for s in range(seq_len):                       # static unroll (S is small)
        tok = ids_ref[b, s]                        # scalar from SMEM
        rows.append(emb_ref[tok] + pe_ref[pl.ds(s, 1), :])   # (1, D)
    o_ref[...] = jnp.concatenate(rows, axis=0)     # single dense (S, D) store


def _attn_block_kernel(x_ref, wqkv_ref, bqkv_ref, wo_ref, bo_ref,
                       g_ref, beta_ref, o_ref, *, num_heads, scale, eps):
    """Fused: QKV projection -> MHA -> output proj -> +residual -> LayerNorm."""
    x = x_ref[...]                                 # [S, D]
    d = x.shape[1]
    dh = d // num_heads

    qkv = jnp.dot(x, wqkv_ref[...],
                  preferred_element_type=jnp.float32) + bqkv_ref[...]   # [S, 3D]

    heads = []
    for h in range(num_heads):                     # static unroll over heads
        qh = qkv[:, h * dh:(h + 1) * dh]
        kh = qkv[:, d + h * dh:d + (h + 1) * dh]
        vh = qkv[:, 2 * d + h * dh:2 * d + (h + 1) * dh]
        # q @ k^T without materializing a transpose.
        scores = jax.lax.dot_general(
            qh, kh, (((1,), (1,)), ((), ())),
            preferred_element_type=jnp.float32) * scale            # [S, S]
        scores = scores - jnp.max(scores, axis=-1, keepdims=True)
        p = jnp.exp(scores)
        denom = jnp.sum(p, axis=-1, keepdims=True)
        p = p * pl.reciprocal(denom, approx=True)                  # EUP slot
        heads.append(jnp.dot(p, vh, preferred_element_type=jnp.float32))
    attn = jnp.concatenate(heads, axis=-1)                         # [S, D]

    proj = jnp.dot(attn, wo_ref[...],
                   preferred_element_type=jnp.float32) + bo_ref[...]
    y = x + proj                                                   # residual
    mu = jnp.mean(y, axis=-1, keepdims=True)
    yc = y - mu
    var = jnp.mean(yc * yc, axis=-1, keepdims=True)
    o_ref[...] = (yc * jax.lax.rsqrt(var + eps) * g_ref[...]
                  + beta_ref[...]).astype(o_ref.dtype)


def _ffn_block_kernel(x_ref, w1_ref, b1_ref, w2_ref, b2_ref,
                      g_ref, beta_ref, o_ref, *, eps):
    """Fused: FF1 + ReLU + FF2 + residual add + LayerNorm."""
    x = x_ref[...]                                                 # [S, D]
    h = jnp.dot(x, w1_ref[...], preferred_element_type=jnp.float32) + b1_ref[...]
    h = jnp.maximum(h, 0.0)
    ff = jnp.dot(h, w2_ref[...], preferred_element_type=jnp.float32) + b2_ref[...]
    y = x + ff
    mu = jnp.mean(y, axis=-1, keepdims=True)
    yc = y - mu
    var = jnp.mean(yc * yc, axis=-1, keepdims=True)
    o_ref[...] = (yc * jax.lax.rsqrt(var + eps) * g_ref[...]
                  + beta_ref[...]).astype(o_ref.dtype)


def _classifier_kernel(x_ref, w_ref, b_ref, o_ref):
    o_ref[...] = (jnp.dot(x_ref[...], w_ref[...],
                          preferred_element_type=jnp.float32)
                  + b_ref[...]).astype(o_ref.dtype)


# ------------------------------ kernel wrappers -----------------------------

_VMEM = pltpu.MemorySpace.VMEM
_SMEM = pltpu.MemorySpace.SMEM


def embed_with_pe(tokens, embedding, pos_enc):
    """tokens: [B, S] int32, embedding: [V, D], pos_enc: [S, D] -> [B, S, D]."""
    b, s = tokens.shape
    v, d = embedding.shape
    return pl.pallas_call(
        _embed_pe_kernel,
        out_shape=jax.ShapeDtypeStruct((b, s, d), jnp.float32),
        grid=(b,),
        in_specs=[
            pl.BlockSpec(memory_space=_SMEM),     # token ids
            pl.BlockSpec(memory_space=_VMEM),     # embedding table [V,1,D]
            pl.BlockSpec(memory_space=_VMEM),     # positional encoding
        ],
        out_specs=pl.BlockSpec((None, s, d), lambda i: (i, 0, 0)),
        compiler_params=pltpu.CompilerParams(dimension_semantics=("parallel",)),
    )(tokens, embedding.reshape(v, 1, d), pos_enc)


def fused_attention_block(x, wqkv, bqkv, wo, bo, ln_g, ln_b, *,
                          num_heads, eps=1e-5):
    """x: [B, S, D] -> LayerNorm(x + MHA(x)) : [B, S, D]."""
    b, s, d = x.shape
    scale = 1.0 / math.sqrt(d // num_heads)
    return pl.pallas_call(
        functools.partial(_attn_block_kernel, num_heads=num_heads,
                          scale=scale, eps=eps),
        out_shape=jax.ShapeDtypeStruct((b, s, d), jnp.float32),
        grid=(b,),
        in_specs=[
            pl.BlockSpec((None, s, d), lambda i: (i, 0, 0)),   # x (per batch)
            pl.BlockSpec(memory_space=_VMEM),                  # wqkv [D,3D]
            pl.BlockSpec(memory_space=_VMEM),                  # bqkv [1,3D]
            pl.BlockSpec(memory_space=_VMEM),                  # wo   [D,D]
            pl.BlockSpec(memory_space=_VMEM),                  # bo   [1,D]
            pl.BlockSpec(memory_space=_VMEM),                  # ln gamma [1,D]
            pl.BlockSpec(memory_space=_VMEM),                  # ln beta  [1,D]
        ],
        out_specs=pl.BlockSpec((None, s, d), lambda i: (i, 0, 0)),
        compiler_params=pltpu.CompilerParams(dimension_semantics=("parallel",)),
    )(x, wqkv, bqkv.reshape(1, -1), wo, bo.reshape(1, -1),
      ln_g.reshape(1, -1), ln_b.reshape(1, -1))


def fused_ffn_block(x, w1, b1, w2, b2, ln_g, ln_b, *, eps=1e-5):
    """x: [B, S, D] -> LayerNorm(x + FF2(ReLU(FF1(x)))) : [B, S, D]."""
    b, s, d = x.shape
    return pl.pallas_call(
        functools.partial(_ffn_block_kernel, eps=eps),
        out_shape=jax.ShapeDtypeStruct((b, s, d), jnp.float32),
        grid=(b,),
        in_specs=[
            pl.BlockSpec((None, s, d), lambda i: (i, 0, 0)),   # x (per batch)
            pl.BlockSpec(memory_space=_VMEM),                  # w1 [D,F]
            pl.BlockSpec(memory_space=_VMEM),                  # b1 [1,F]
            pl.BlockSpec(memory_space=_VMEM),                  # w2 [F,D]
            pl.BlockSpec(memory_space=_VMEM),                  # b2 [1,D]
            pl.BlockSpec(memory_space=_VMEM),                  # ln gamma
            pl.BlockSpec(memory_space=_VMEM),                  # ln beta
        ],
        out_specs=pl.BlockSpec((None, s, d), lambda i: (i, 0, 0)),
        compiler_params=pltpu.CompilerParams(dimension_semantics=("parallel",)),
    )(x, w1, b1.reshape(1, -1), w2, b2.reshape(1, -1),
      ln_g.reshape(1, -1), ln_b.reshape(1, -1))


def classifier_linear(x, w, b):
    """x: [B, K], w: [K, Npad], b: [Npad] -> [B, Npad] (lane-dense output)."""
    m, _ = x.shape
    n = w.shape[1]
    return pl.pallas_call(
        _classifier_kernel,
        out_shape=jax.ShapeDtypeStruct((m, n), jnp.float32),
        in_specs=[pl.BlockSpec(memory_space=_VMEM)] * 3,
        out_specs=pl.BlockSpec(memory_space=_VMEM),
    )(x, w, b.reshape(1, n))


# ------------------------------ model pieces -------------------------------

def sinusoidal_pe(seq_len, d_model):
    pos = jnp.arange(seq_len, dtype=jnp.float32)[:, None]
    i = jnp.arange(0, d_model, 2, dtype=jnp.float32)[None, :]
    div = jnp.exp(-(math.log(10000.0)) * i / d_model)
    pe = jnp.zeros((seq_len, d_model), dtype=jnp.float32)
    pe = pe.at[:, 0::2].set(jnp.sin(pos * div))
    pe = pe.at[:, 1::2].set(jnp.cos(pos * div))
    return pe


def encoder_only_classifier(params, tokens, *, num_heads, num_classes):
    # embedding gather + positional encoding (dropout = identity in eval)
    x = embed_with_pe(tokens, params["embedding"], params["pos_enc"])  # [B,S,D]
    for layer in params["layers"]:
        x = fused_attention_block(
            x, layer["wqkv"], layer["bqkv"], layer["wo"], layer["bo"],
            layer["ln1_g"], layer["ln1_b"], num_heads=num_heads)
        x = fused_ffn_block(
            x, layer["w1"], layer["b1"], layer["w2"], layer["b2"],
            layer["ln2_g"], layer["ln2_b"])
    b, s, d = x.shape
    flat = x.reshape(b, s * d)                                   # nn.Flatten
    logits_padded = classifier_linear(flat, params["cls_w"], params["cls_b"])
    return logits_padded[:, :num_classes]


# ------------------------------ parameter init ------------------------------

def init_params(key, *, num_tokens, num_classes, num_encoders, num_heads,
                d_model, d_feedforward, seq_len, padded_classes=128):
    def dense(k, fan_in, fan_out):
        lim = 1.0 / math.sqrt(fan_in)
        kw, kb = jax.random.split(k)
        w = jax.random.uniform(kw, (fan_in, fan_out), jnp.float32, -lim, lim)
        b = jax.random.uniform(kb, (fan_out,), jnp.float32, -lim, lim)
        return w, b

    assert d_model % num_heads == 0
    keys = jax.random.split(key, num_encoders + 2)
    params = {
        "embedding": jax.random.normal(keys[0], (num_tokens, d_model), jnp.float32),
        "pos_enc": sinusoidal_pe(seq_len, d_model),
        "layers": [],
    }
    for i in range(num_encoders):
        ks = jax.random.split(keys[1 + i], 6)
        wq, bq = dense(ks[0], d_model, d_model)
        wk, bk = dense(ks[1], d_model, d_model)
        wv, bv = dense(ks[2], d_model, d_model)
        wo, bo = dense(ks[3], d_model, d_model)
        w1, b1 = dense(ks[4], d_model, d_feedforward)
        w2, b2 = dense(ks[5], d_feedforward, d_model)
        params["layers"].append({
            "wqkv": jnp.concatenate([wq, wk, wv], axis=1),   # [D, 3D]
            "bqkv": jnp.concatenate([bq, bk, bv], axis=0),   # [3D]
            "wo": wo, "bo": bo,
            "w1": w1, "b1": b1, "w2": w2, "b2": b2,
            "ln1_g": jnp.ones((d_model,), jnp.float32),
            "ln1_b": jnp.zeros((d_model,), jnp.float32),
            "ln2_g": jnp.ones((d_model,), jnp.float32),
            "ln2_b": jnp.zeros((d_model,), jnp.float32),
        })
    cls_w, cls_b = dense(keys[-1], seq_len * d_model, num_classes)
    n_pad = max(padded_classes, num_classes)
    # pad classifier output dim to 128 lanes (unmasked stores); slice in wrapper
    params["cls_w"] = jnp.pad(cls_w, ((0, 0), (0, n_pad - num_classes)))
    params["cls_b"] = jnp.pad(cls_b, ((0, n_pad - num_classes),))
    return params


# ----------------------------------- main -----------------------------------

if __name__ == "__main__":
    # Small, shape-consistent configuration (scaled-down from the defaults).
    NUM_TOKENS = 100
    NUM_CLASSES = 2
    NUM_ENCODERS = 2
    NUM_HEADS = 4
    D_MODEL = 32
    D_FF = 64
    SEQ_LEN = 8
    BATCH = 2

    key = jax.random.PRNGKey(0)
    k_param, k_tok = jax.random.split(key)

    params = init_params(
        k_param, num_tokens=NUM_TOKENS, num_classes=NUM_CLASSES,
        num_encoders=NUM_ENCODERS, num_heads=NUM_HEADS, d_model=D_MODEL,
        d_feedforward=D_FF, seq_len=SEQ_LEN)

    tokens = jax.random.randint(k_tok, (BATCH, SEQ_LEN), 0, NUM_TOKENS,
                                dtype=jnp.int32)

    # num_heads / num_classes are bound statically (not traced pytree leaves).
    fwd = jax.jit(functools.partial(encoder_only_classifier,
                                    num_heads=NUM_HEADS,
                                    num_classes=NUM_CLASSES))

    # TODO(synk): the original PositionalEncoding / EncoderLayer sources were not
    # provided; standard sinusoidal PE + post-LN transformer encoder semantics
    # are assumed (dropout is identity in eval mode).
    logits = fwd(params, tokens)
    jax.block_until_ready(logits)
    assert logits.shape == (BATCH, NUM_CLASSES), logits.shape
    assert bool(jnp.all(jnp.isfinite(logits)))
    print("KERNEL_OK")
</pallas_src>

<mosaic_0001>
module attributes {stable_mosaic.version = 11 : i64} {
  func.func @_attn_block_kernel(%arg0: i32, %arg1: memref<1x8x32xf32, #tpu.memory_space<vmem>>, %arg2: memref<32x96xf32, #tpu.memory_space<vmem>>, %arg3: memref<1x96xf32, #tpu.memory_space<vmem>>, %arg4: memref<32x32xf32, #tpu.memory_space<vmem>>, %arg5: memref<1x32xf32, #tpu.memory_space<vmem>>, %arg6: memref<1x32xf32, #tpu.memory_space<vmem>>, %arg7: memref<1x32xf32, #tpu.memory_space<vmem>>, %arg8: memref<1x8x32xf32, #tpu.memory_space<vmem>>) attributes {dimension_semantics = [#tpu.dimension_semantics<parallel>], iteration_bounds = array<i64: 2>, scalar_prefetch = 0 : i64, scratch_operands = 0 : i64, tpu.core_type = #tpu.core_type<tc>, window_params = [{transform_indices = @transform_0, window_bounds = array<i64: 1, 8, 32>}, {pipeline_mode = #tpu.pipeline_mode<synchronous>, transform_indices = @transform_1, window_bounds = array<i64: 32, 96>}, {pipeline_mode = #tpu.pipeline_mode<synchronous>, transform_indices = @transform_2, window_bounds = array<i64: 1, 96>}, {pipeline_mode = #tpu.pipeline_mode<synchronous>, transform_indices = @transform_3, window_bounds = array<i64: 32, 32>}, {pipeline_mode = #tpu.pipeline_mode<synchronous>, transform_indices = @transform_4, window_bounds = array<i64: 1, 32>}, {pipeline_mode = #tpu.pipeline_mode<synchronous>, transform_indices = @transform_5, window_bounds = array<i64: 1, 32>}, {pipeline_mode = #tpu.pipeline_mode<synchronous>, transform_indices = @transform_6, window_bounds = array<i64: 1, 32>}, {transform_indices = @transform_7, window_bounds = array<i64: 1, 8, 32>}]} {
    %c0 = arith.constant 0 : index
    %c0_0 = arith.constant 0 : index
    %c0_1 = arith.constant 0 : index
    %0 = vector.load %arg1[%c0, %c0_0, %c0_1] : memref<1x8x32xf32, #tpu.memory_space<vmem>>, vector<1x8x32xf32>
    %1 = vector.shape_cast %0 : vector<1x8x32xf32> to vector<8x32xf32>
    %c0_2 = arith.constant 0 : index
    %c0_3 = arith.constant 0 : index
    %2 = vector.load %arg2[%c0_2, %c0_3] : memref<32x96xf32, #tpu.memory_space<vmem>>, vector<32x96xf32>
    %cst = arith.constant dense<0.000000e+00> : vector<8x96xf32>
    %3 = tpu.matmul %1, %2, %cst {dimension_numbers = #tpu.dot_dimension_numbers<[1], [0], [0], [1], [0, 0, 1, 1], [], []>} : vector<8x32xf32>, vector<32x96xf32>, vector<8x96xf32> -> vector<8x96xf32>
    %c0_4 = arith.constant 0 : index
    %c0_5 = arith.constant 0 : index
    %4 = vector.load %arg3[%c0_4, %c0_5] : memref<1x96xf32, #tpu.memory_space<vmem>>, vector<1x96xf32>
    %5 = vector.broadcast %4 : vector<1x96xf32> to vector<8x96xf32>
    %6 = arith.addf %3, %5 : vector<8x96xf32>
    %7 = vector.extract_strided_slice %6 {offsets = [0, 0], sizes = [8, 8], strides = [1, 1]} : vector<8x96xf32> to vector<8x8xf32>
    %8 = vector.extract_strided_slice %6 {offsets = [0, 32], sizes = [8, 8], strides = [1, 1]} : vector<8x96xf32> to vector<8x8xf32>
    %9 = vector.extract_strided_slice %6 {offsets = [0, 64], sizes = [8, 8], strides = [1, 1]} : vector<8x96xf32> to vector<8x8xf32>
    %cst_6 = arith.constant dense<0.000000e+00> : vector<8x8xf32>
    %10 = tpu.matmul %7, %8, %cst_6 {dimension_numbers = #tpu.dot_dimension_numbers<[1], [1], [0], [0], [0, 0, 1, 0], [], []>} : vector<8x8xf32>, vector<8x8xf32>, vector<8x8xf32> -> vector<8x8xf32>
    %cst_7 = arith.constant 0.353553385 : f32
    %11 = vector.broadcast %cst_7 : f32 to vector<8x8xf32>
    %12 = arith.mulf %10, %11 : vector<8x8xf32>
    %cst_8 = arith.constant dense<0xFF800000> : vector<8xf32>
    %13 = vector.multi_reduction <maximumf>, %12, %cst_8 [1] : vector<8x8xf32> to vector<8xf32>
    %14 = vector.shape_cast %13 : vector<8xf32> to vector<8x1xf32>
    %15 = vector.broadcast %14 : vector<8x1xf32> to vector<8x8xf32>
    %16 = arith.subf %12, %15 : vector<8x8xf32>
    %17 = math.exp %16 : vector<8x8xf32>
    %cst_9 = arith.constant dense<0.000000e+00> : vector<8xf32>
    %18 = vector.multi_reduction <add>, %17, %cst_9 [1] : vector<8x8xf32> to vector<8xf32>
    %19 = vector.shape_cast %18 : vector<8xf32> to vector<8x1xf32>
    %20 = tpu.reciprocal %19 {approx = true} : vector<8x1xf32> -> vector<8x1xf32>
    %21 = vector.broadcast %20 : vector<8x1xf32> to vector<8x8xf32>
    %22 = arith.mulf %17, %21 : vector<8x8xf32>
    %cst_10 = arith.constant dense<0.000000e+00> : vector<8x8xf32>
    %23 = tpu.matmul %22, %9, %cst_10 {dimension_numbers = #tpu.dot_dimension_numbers<[1], [0], [0], [1], [0, 0, 1, 1], [], []>} : vector<8x8xf32>, vector<8x8xf32>, vector<8x8xf32> -> vector<8x8xf32>
    %24 = vector.extract_strided_slice %6 {offsets = [0, 8], sizes = [8, 8], strides = [1, 1]} : vector<8x96xf32> to vector<8x8xf32>
    %25 = vector.extract_strided_slice %6 {offsets = [0, 40], sizes = [8, 8], strides = [1, 1]} : vector<8x96xf32> to vector<8x8xf32>
    %26 = vector.extract_strided_slice %6 {offsets = [0, 72], sizes = [8, 8], strides = [1, 1]} : vector<8x96xf32> to vector<8x8xf32>
    %cst_11 = arith.constant dense<0.000000e+00> : vector<8x8xf32>
    %27 = tpu.matmul %24, %25, %cst_11 {dimension_numbers = #tpu.dot_dimension_numbers<[1], [1], [0], [0], [0, 0, 1, 0], [], []>} : vector<8x8xf32>, vector<8x8xf32>, vector<8x8xf32> -> vector<8x8xf32>
    %cst_12 = arith.constant 0.353553385 : f32
    %28 = vector.broadcast %cst_12 : f32 to vector<8x8xf32>
    %29 = arith.mulf %27, %28 : vector<8x8xf32>
    %cst_13 = arith.constant dense<0xFF800000> : vector<8xf32>
    %30 = vector.multi_reduction <maximumf>, %29, %cst_13 [1] : vector<8x8xf32> to vector<8xf32>
    %31 = vector.shape_cast %30 : vector<8xf32> to vector<8x1xf32>
    %32 = vector.broadcast %31 : vector<8x1xf32> to vector<8x8xf32>
    %33 = arith.subf %29, %32 : vector<8x8xf32>
    %34 = math.exp %33 : vector<8x8xf32>
    %cst_14 = arith.constant dense<0.000000e+00> : vector<8xf32>
    %35 = vector.multi_reduction <add>, %34, %cst_14 [1] : vector<8x8xf32> to vector<8xf32>
    %36 = vector.shape_cast %35 : vector<8xf32> to vector<8x1xf32>
    %37 = tpu.reciprocal %36 {approx = true} : vector<8x1xf32> -> vector<8x1xf32>
    %38 = vector.broadcast %37 : vector<8x1xf32> to vector<8x8xf32>
    %39 = arith.mulf %34, %38 : vector<8x8xf32>
    %cst_15 = arith.constant dense<0.000000e+00> : vector<8x8xf32>
    %40 = tpu.matmul %39, %26, %cst_15 {dimension_numbers = #tpu.dot_dimension_numbers<[1], [0], [0], [1], [0, 0, 1, 1], [], []>} : vector<8x8xf32>, vector<8x8xf32>, vector<8x8xf32> -> vector<8x8xf32>
    %41 = vector.extract_strided_slice %6 {offsets = [0, 16], sizes = [8, 8], strides = [1, 1]} : vector<8x96xf32> to vector<8x8xf32>
    %42 = vector.extract_strided_slice %6 {offsets = [0, 48], sizes = [8, 8], strides = [1, 1]} : vector<8x96xf32> to vector<8x8xf32>
    %43 = vector.extract_strided_slice %6 {offsets = [0, 80], sizes = [8, 8], strides = [1, 1]} : vector<8x96xf32> to vector<8x8xf32>
    %cst_16 = arith.constant dense<0.000000e+00> : vector<8x8xf32>
    %44 = tpu.matmul %41, %42, %cst_16 {dimension_numbers = #tpu.dot_dimension_numbers<[1], [1], [0], [0], [0, 0, 1, 0], [], []>} : vector<8x8xf32>, vector<8x8xf32>, vector<8x8xf32> -> vector<8x8xf32>
    %cst_17 = arith.constant 0.353553385 : f32
    %45 = vector.broadcast %cst_17 : f32 to vector<8x8xf32>
    %46 = arith.mulf %44, %45 : vector<8x8xf32>
    %cst_18 = arith.constant dense<0xFF800000> : vector<8xf32>
    %47 = vector.multi_reduction <maximumf>, %46, %cst_18 [1] : vector<8x8xf32> to vector<8xf32>
    %48 = vector.shape_cast %47 : vector<8xf32> to vector<8x1xf32>
    %49 = vector.broadcast %48 : vector<8x1xf32> to vector<8x8xf32>
    %50 = arith.subf %46, %49 : vector<8x8xf32>
    %51 = math.exp %50 : vector<8x8xf32>
    %cst_19 = arith.constant dense<0.000000e+00> : vector<8xf32>
    %52 = vector.multi_reduction <add>, %51, %cst_19 [1] : vector<8x8xf32> to vector<8xf32>
    %53 = vector.shape_cast %52 : vector<8xf32> to vector<8x1xf32>
    %54 = tpu.reciprocal %53 {approx = true} : vector<8x1xf32> -> vector<8x1xf32>
    %55 = vector.broadcast %54 : vector<8x1xf32> to vector<8x8xf32>
    %56 = arith.mulf %51, %55 : vector<8x8xf32>
    %cst_20 = arith.constant dense<0.000000e+00> : vector<8x8xf32>
    %57 = tpu.matmul %56, %43, %cst_20 {dimension_numbers = #tpu.dot_dimension_numbers<[1], [0], [0], [1], [0, 0, 1, 1], [], []>} : vector<8x8xf32>, vector<8x8xf32>, vector<8x8xf32> -> vector<8x8xf32>
    %58 = vector.extract_strided_slice %6 {offsets = [0, 24], sizes = [8, 8], strides = [1, 1]} : vector<8x96xf32> to vector<8x8xf32>
    %59 = vector.extract_strided_slice %6 {offsets = [0, 56], sizes = [8, 8], strides = [1, 1]} : vector<8x96xf32> to vector<8x8xf32>
    %60 = vector.extract_strided_slice %6 {offsets = [0, 88], sizes = [8, 8], strides = [1, 1]} : vector<8x96xf32> to vector<8x8xf32>
    %cst_21 = arith.constant dense<0.000000e+00> : vector<8x8xf32>
    %61 = tpu.matmul %58, %59, %cst_21 {dimension_numbers = #tpu.dot_dimension_numbers<[1], [1], [0], [0], [0, 0, 1, 0], [], []>} : vector<8x8xf32>, vector<8x8xf32>, vector<8x8xf32> -> vector<8x8xf32>
    %cst_22 = arith.constant 0.353553385 : f32
    %62 = vector.broadcast %cst_22 : f32 to vector<8x8xf32>
    %63 = arith.mulf %61, %62 : vector<8x8xf32>
    %cst_23 = arith.constant dense<0xFF800000> : vector<8xf32>
    %64 = vector.multi_reduction <maximumf>, %63, %cst_23 [1] : vector<8x8xf32> to vector<8xf32>
    %65 = vector.shape_cast %64 : vector<8xf32> to vector<8x1xf32>
    %66 = vector.broadcast %65 : vector<8x1xf32> to vector<8x8xf32>
    %67 = arith.subf %63, %66 : vector<8x8xf32>
    %68 = math.exp %67 : vector<8x8xf32>
    %cst_24 = arith.constant dense<0.000000e+00> : vector<8xf32>
    %69 = vector.multi_reduction <add>, %68, %cst_24 [1] : vector<8x8xf32> to vector<8xf32>
    %70 = vector.shape_cast %69 : vector<8xf32> to vector<8x1xf32>
    %71 = tpu.reciprocal %70 {approx = true} : vector<8x1xf32> -> vector<8x1xf32>
    %72 = vector.broadcast %71 : vector<8x1xf32> to vector<8x8xf32>
    %73 = arith.mulf %68, %72 : vector<8x8xf32>
    %cst_25 = arith.constant dense<0.000000e+00> : vector<8x8xf32>
    %74 = tpu.matmul %73, %60, %cst_25 {dimension_numbers = #tpu.dot_dimension_numbers<[1], [0], [0], [1], [0, 0, 1, 1], [], []>} : vector<8x8xf32>, vector<8x8xf32>, vector<8x8xf32> -> vector<8x8xf32>
    %75 = tpu.concatenate %23, %40, %57, %74 in 1 : vector<8x8xf32>, vector<8x8xf32>, vector<8x8xf32>, vector<8x8xf32> -> vector<8x32xf32>
    %c0_26 = arith.constant 0 : index
    %c0_27 = arith.constant 0 : index
    %76 = vector.load %arg4[%c0_26, %c0_27] : memref<32x32xf32, #tpu.memory_space<vmem>>, vector<32x32xf32>
    %cst_28 = arith.constant dense<0.000000e+00> : vector<8x32xf32>
    %77 = tpu.matmul %75, %76, %cst_28 {dimension_numbers = #tpu.dot_dimension_numbers<[1], [0], [0], [1], [0, 0, 1, 1], [], []>} : vector<8x32xf32>, vector<32x32xf32>, vector<8x32xf32> -> vector<8x32xf32>
    %c0_29 = arith.constant 0 : index
    %c0_30 = arith.constant 0 : index
    %78 = vector.load %arg5[%c0_29, %c0_30] : memref<1x32xf32, #tpu.memory_space<vmem>>, vector<1x32xf32>
    %79 = vector.broadcast %78 : vector<1x32xf32> to vector<8x32xf32>
    %80 = arith.addf %77, %79 : vector<8x32xf32>
    %81 = arith.addf %1, %80 : vector<8x32xf32>
    %cst_31 = arith.constant dense<0.000000e+00> : vector<8xf32>
    %82 = vector.multi_reduction <add>, %81, %cst_31 [1] : vector<8x32xf32> to vector<8xf32>
    %83 = vector.shape_cast %82 : vector<8xf32> to vector<8x1xf32>
    %cst_32 = arith.constant 3.200000e+01 : f32
    %84 = vector.broadcast %cst_32 : f32 to vector<8x1xf32>
    %85 = arith.divf %83, %84 : vector<8x1xf32>
    %86 = vector.broadcast %85 : vector<8x1xf32> to vector<8x32xf32>
    %87 = arith.subf %81, %86 : vector<8x32xf32>
    %88 = arith.mulf %87, %87 : vector<8x32xf32>
    %cst_33 = arith.constant dense<0.000000e+00> : vector<8xf32>
    %89 = vector.multi_reduction <add>, %88, %cst_33 [1] : vector<8x32xf32> to vector<8xf32>
    %90 = vector.shape_cast %89 : vector<8xf32> to vector<8x1xf32>
    %cst_34 = arith.constant 3.200000e+01 : f32
    %91 = vector.broadcast %cst_34 : f32 to vector<8x1xf32>
    %92 = arith.divf %90, %91 : vector<8x1xf32>
    %cst_35 = arith.constant 9.99999974E-6 : f32
    %93 = vector.broadcast %cst_35 : f32 to vector<8x1xf32>
    %94 = arith.addf %92, %93 : vector<8x1xf32>
    %95 = math.rsqrt %94 : vector<8x1xf32>
    %96 = vector.broadcast %95 : vector<8x1xf32> to vector<8x32xf32>
    %97 = arith.mulf %87, %96 : vector<8x32xf32>
    %c0_36 = arith.constant 0 : index
    %c0_37 = arith.constant 0 : index
    %98 = vector.load %arg6[%c0_36, %c0_37] : memref<1x32xf32, #tpu.memory_space<vmem>>, vector<1x32xf32>
    %99 = vector.broadcast %98 : vector<1x32xf32> to vector<8x32xf32>
    %100 = arith.mulf %97, %99 : vector<8x32xf32>
    %c0_38 = arith.constant 0 : index
    %c0_39 = arith.constant 0 : index
    %101 = vector.load %arg7[%c0_38, %c0_39] : memref<1x32xf32, #tpu.memory_space<vmem>>, vector<1x32xf32>
    %102 = vector.broadcast %101 : vector<1x32xf32> to vector<8x32xf32>
    %103 = arith.addf %100, %102 : vector<8x32xf32>
    %c0_40 = arith.constant 0 : index
    %c0_41 = arith.constant 0 : index
    %c0_42 = arith.constant 0 : index
    %104 = vector.load %arg8[%c0_40, %c0_41, %c0_42] : memref<1x8x32xf32, #tpu.memory_space<vmem>>, vector<1x8x32xf32>
    %105 = vector.shape_cast %104 : vector<1x8x32xf32> to vector<8x32xf32>
    %106 = vector.shape_cast %103 : vector<8x32xf32> to vector<1x8x32xf32>
    tpu.vector_store %arg8[%c0_40, %c0_41, %c0_42], %106 {strides = array<i32>} : memref<1x8x32xf32, #tpu.memory_space<vmem>>, vector<1x8x32xf32>,
    return
  }
  func.func @transform_0(%arg0: i32) -> (i32, i32, i32) {
    %c0_i32 = arith.constant 0 : i32
    %c0_i32_0 = arith.constant 0 : i32
    %c0_i32_1 = arith.constant 0 : i32
    return %arg0, %c0_i32, %c0_i32_0 : i32, i32, i32
  }
  func.func @transform_1(%arg0: i32) -> (i32, i32) {
    %c0_i32 = arith.constant 0 : i32
    %c0_i32_0 = arith.constant 0 : i32
    %c0_i32_1 = arith.constant 0 : i32
    return %c0_i32, %c0_i32_0 : i32, i32
  }
  func.func @transform_2(%arg0: i32) -> (i32, i32) {
    %c0_i32 = arith.constant 0 : i32
    %c0_i32_0 = arith.constant 0 : i32
    %c0_i32_1 = arith.constant 0 : i32
    return %c0_i32, %c0_i32_0 : i32, i32
  }
  func.func @transform_3(%arg0: i32) -> (i32, i32) {
    %c0_i32 = arith.constant 0 : i32
    %c0_i32_0 = arith.constant 0 : i32
    %c0_i32_1 = arith.constant 0 : i32
    return %c0_i32, %c0_i32_0 : i32, i32
  }
  func.func @transform_4(%arg0: i32) -> (i32, i32) {
    %c0_i32 = arith.constant 0 : i32
    %c0_i32_0 = arith.constant 0 : i32
    %c0_i32_1 = arith.constant 0 : i32
    return %c0_i32, %c0_i32_0 : i32, i32
  }
  func.func @transform_5(%arg0: i32) -> (i32, i32) {
    %c0_i32 = arith.constant 0 : i32
    %c0_i32_0 = arith.constant 0 : i32
    %c0_i32_1 = arith.constant 0 : i32
    return %c0_i32, %c0_i32_0 : i32, i32
  }
  func.func @transform_6(%arg0: i32) -> (i32, i32) {
    %c0_i32 = arith.constant 0 : i32
    %c0_i32_0 = arith.constant 0 : i32
    %c0_i32_1 = arith.constant 0 : i32
    return %c0_i32, %c0_i32_0 : i32, i32
  }
  func.func @transform_7(%arg0: i32) -> (i32, i32, i32) {
    %c0_i32 = arith.constant 0 : i32
    %c0_i32_0 = arith.constant 0 : i32
    %c0_i32_1 = arith.constant 0 : i32
    return %arg0, %c0_i32, %c0_i32_0 : i32, i32, i32
  }
}

module attributes {stable_mosaic.version = 11 : i64} {
  func.func @_embed_pe_kernel(%arg0: i32, %arg1: memref<2x8xi32, #tpu.memory_space<smem>>, %arg2: memref<100x1x32xf32, #tpu.memory_space<vmem>>, %arg3: memref<8x32xf32, #tpu.memory_space<vmem>>, %arg4: memref<1x8x32xf32, #tpu.memory_space<vmem>>) attributes {dimension_semantics = [#tpu.dimension_semantics<parallel>], iteration_bounds = array<i64: 2>, scalar_prefetch = 0 : i64, scratch_operands = 0 : i64, tpu.core_type = #tpu.core_type<tc>, window_params = [{transform_indices = @transform_0, window_bounds = array<i64: 2, 8>}, {pipeline_mode = #tpu.pipeline_mode<synchronous>, transform_indices = @transform_1, window_bounds = array<i64: 100, 1, 32>}, {pipeline_mode = #tpu.pipeline_mode<synchronous>, transform_indices = @transform_2, window_bounds = array<i64: 8, 32>}, {transform_indices = @transform_3, window_bounds = array<i64: 1, 8, 32>}]} {
    %0 = arith.index_cast %arg0 : i32 to index
    %c0 = arith.constant 0 : index
    %1 = memref.load %arg1[%0, %c0] : memref<2x8xi32, #tpu.memory_space<smem>>
    %2 = arith.index_cast %1 : i32 to index
    %c0_0 = arith.constant 0 : index
    %c0_1 = arith.constant 0 : index
    %3 = vector.load %arg2[%2, %c0_0, %c0_1] : memref<100x1x32xf32, #tpu.memory_space<vmem>>, vector<1x1x32xf32>
    %4 = vector.shape_cast %3 : vector<1x1x32xf32> to vector<1x32xf32>
    %c0_2 = arith.constant 0 : index
    %c0_3 = arith.constant 0 : index
    %5 = vector.load %arg3[%c0_2, %c0_3] : memref<8x32xf32, #tpu.memory_space<vmem>>, vector<1x32xf32>
    %6 = arith.addf %4, %5 : vector<1x32xf32>
    %7 = arith.index_cast %arg0 : i32 to index
    %c1 = arith.constant 1 : index
    %8 = memref.load %arg1[%7, %c1] : memref<2x8xi32, #tpu.memory_space<smem>>
    %9 = arith.index_cast %8 : i32 to index
    %c0_4 = arith.constant 0 : index
    %c0_5 = arith.constant 0 : index
    %10 = vector.load %arg2[%9, %c0_4, %c0_5] : memref<100x1x32xf32, #tpu.memory_space<vmem>>, vector<1x1x32xf32>
    %11 = vector.shape_cast %10 : vector<1x1x32xf32> to vector<1x32xf32>
    %c1_6 = arith.constant 1 : index
    %c0_7 = arith.constant 0 : index
    %12 = vector.load %arg3[%c1_6, %c0_7] : memref<8x32xf32, #tpu.memory_space<vmem>>, vector<1x32xf32>
    %13 = arith.addf %11, %12 : vector<1x32xf32>
    %14 = arith.index_cast %arg0 : i32 to index
    %c2 = arith.constant 2 : index
    %15 = memref.load %arg1[%14, %c2] : memref<2x8xi32, #tpu.memory_space<smem>>
    %16 = arith.index_cast %15 : i32 to index
    %c0_8 = arith.constant 0 : index
    %c0_9 = arith.constant 0 : index
    %17 = vector.load %arg2[%16, %c0_8, %c0_9] : memref<100x1x32xf32, #tpu.memory_space<vmem>>, vector<1x1x32xf32>
    %18 = vector.shape_cast %17 : vector<1x1x32xf32> to vector<1x32xf32>
    %c2_10 = arith.constant 2 : index
    %c0_11 = arith.constant 0 : index
    %19 = vector.load %arg3[%c2_10, %c0_11] : memref<8x32xf32, #tpu.memory_space<vmem>>, vector<1x32xf32>
    %20 = arith.addf %18, %19 : vector<1x32xf32>
    %21 = arith.index_cast %arg0 : i32 to index
    %c3 = arith.constant 3 : index
    %22 = memref.load %arg1[%21, %c3] : memref<2x8xi32, #tpu.memory_space<smem>>
    %23 = arith.index_cast %22 : i32 to index
    %c0_12 = arith.constant 0 : index
    %c0_13 = arith.constant 0 : index
    %24 = vector.load %arg2[%23, %c0_12, %c0_13] : memref<100x1x32xf32, #tpu.memory_space<vmem>>, vector<1x1x32xf32>
    %25 = vector.shape_cast %24 : vector<1x1x32xf32> to vector<1x32xf32>
    %c3_14 = arith.constant 3 : index
    %c0_15 = arith.constant 0 : index
    %26 = vector.load %arg3[%c3_14, %c0_15] : memref<8x32xf32, #tpu.memory_space<vmem>>, vector<1x32xf32>
    %27 = arith.addf %25, %26 : vector<1x32xf32>
    %28 = arith.index_cast %arg0 : i32 to index
    %c4 = arith.constant 4 : index
    %29 = memref.load %arg1[%28, %c4] : memref<2x8xi32, #tpu.memory_space<smem>>
    %30 = arith.index_cast %29 : i32 to index
    %c0_16 = arith.constant 0 : index
    %c0_17 = arith.constant 0 : index
    %31 = vector.load %arg2[%30, %c0_16, %c0_17] : memref<100x1x32xf32, #tpu.memory_space<vmem>>, vector<1x1x32xf32>
    %32 = vector.shape_cast %31 : vector<1x1x32xf32> to vector<1x32xf32>
    %c4_18 = arith.constant 4 : index
    %c0_19 = arith.constant 0 : index
    %33 = vector.load %arg3[%c4_18, %c0_19] : memref<8x32xf32, #tpu.memory_space<vmem>>, vector<1x32xf32>
    %34 = arith.addf %32, %33 : vector<1x32xf32>
    %35 = arith.index_cast %arg0 : i32 to index
    %c5 = arith.constant 5 : index
    %36 = memref.load %arg1[%35, %c5] : memref<2x8xi32, #tpu.memory_space<smem>>
    %37 = arith.index_cast %36 : i32 to index
    %c0_20 = arith.constant 0 : index
    %c0_21 = arith.constant 0 : index
    %38 = vector.load %arg2[%37, %c0_20, %c0_21] : memref<100x1x32xf32, #tpu.memory_space<vmem>>, vector<1x1x32xf32>
    %39 = vector.shape_cast %38 : vector<1x1x32xf32> to vector<1x32xf32>
    %c5_22 = arith.constant 5 : index
    %c0_23 = arith.constant 0 : index
    %40 = vector.load %arg3[%c5_22, %c0_23] : memref<8x32xf32, #tpu.memory_space<vmem>>, vector<1x32xf32>
    %41 = arith.addf %39, %40 : vector<1x32xf32>
    %42 = arith.index_cast %arg0 : i32 to index
    %c6 = arith.constant 6 : index
    %43 = memref.load %arg1[%42, %c6] : memref<2x8xi32, #tpu.memory_space<smem>>
    %44 = arith.index_cast %43 : i32 to index
    %c0_24 = arith.constant 0 : index
    %c0_25 = arith.constant 0 : index
    %45 = vector.load %arg2[%44, %c0_24, %c0_25] : memref<100x1x32xf32, #tpu.memory_space<vmem>>, vector<1x1x32xf32>
    %46 = vector.shape_cast %45 : vector<1x1x32xf32> to vector<1x32xf32>
    %c6_26 = arith.constant 6 : index
    %c0_27 = arith.constant 0 : index
    %47 = vector.load %arg3[%c6_26, %c0_27] : memref<8x32xf32, #tpu.memory_space<vmem>>, vector<1x32xf32>
    %48 = arith.addf %46, %47 : vector<1x32xf32>
    %49 = arith.index_cast %arg0 : i32 to index
    %c7 = arith.constant 7 : index
    %50 = memref.load %arg1[%49, %c7] : memref<2x8xi32, #tpu.memory_space<smem>>
    %51 = arith.index_cast %50 : i32 to index
    %c0_28 = arith.constant 0 : index
    %c0_29 = arith.constant 0 : index
    %52 = vector.load %arg2[%51, %c0_28, %c0_29] : memref<100x1x32xf32, #tpu.memory_space<vmem>>, vector<1x1x32xf32>
    %53 = vector.shape_cast %52 : vector<1x1x32xf32> to vector<1x32xf32>
    %c7_30 = arith.constant 7 : index
    %c0_31 = arith.constant 0 : index
    %54 = vector.load %arg3[%c7_30, %c0_31] : memref<8x32xf32, #tpu.memory_space<vmem>>, vector<1x32xf32>
    %55 = arith.addf %53, %54 : vector<1x32xf32>
    %56 = tpu.concatenate %6, %13, %20, %27, %34, %41, %48, %55 in 0 : vector<1x32xf32>, vector<1x32xf32>, vector<1x32xf32>, vector<1x32xf32>, vector<1x32xf32>, vector<1x32xf32>, vector<1x32xf32>, vector<1x32xf32> -> vector<8x32xf32>
    %c0_32 = arith.constant 0 : index
    %c0_33 = arith.constant 0 : index
    %c0_34 = arith.constant 0 : index
    %57 = vector.load %arg4[%c0_32, %c0_33, %c0_34] : memref<1x8x32xf32, #tpu.memory_space<vmem>>, vector<1x8x32xf32>
    %58 = vector.shape_cast %57 : vector<1x8x32xf32> to vector<8x32xf32>
    %59 = vector.shape_cast %56 : vector<8x32xf32> to vector<1x8x32xf32>
    tpu.vector_store %arg4[%c0_32, %c0_33, %c0_34], %59 {strides = array<i32>} : memref<1x8x32xf32, #tpu.memory_space<vmem>>, vector<1x8x32xf32>,
    return
  }
  func.func @transform_0(%arg0: i32) -> (i32, i32) {
    %c0_i32 = arith.constant 0 : i32
    %c0_i32_0 = arith.constant 0 : i32
    %c0_i32_1 = arith.constant 0 : i32
    return %c0_i32, %c0_i32_0 : i32, i32
  }
  func.func @transform_1(%arg0: i32) -> (i32, i32, i32) {
    %c0_i32 = arith.constant 0 : i32
    %c0_i32_0 = arith.constant 0 : i32
    %c0_i32_1 = arith.constant 0 : i32
    %c0_i32_2 = arith.constant 0 : i32
    return %c0_i32, %c0_i32_0, %c0_i32_1 : i32, i32, i32
  }
  func.func @transform_2(%arg0: i32) -> (i32, i32) {
    %c0_i32 = arith.constant 0 : i32
    %c0_i32_0 = arith.constant 0 : i32
    %c0_i32_1 = arith.constant 0 : i32
    return %c0_i32, %c0_i32_0 : i32, i32
  }
  func.func @transform_3(%arg0: i32) -> (i32, i32, i32) {
    %c0_i32 = arith.constant 0 : i32
    %c0_i32_0 = arith.constant 0 : i32
    %c0_i32_1 = arith.constant 0 : i32
    return %arg0, %c0_i32, %c0_i32_0 : i32, i32, i32
  }
}

module attributes {stable_mosaic.version = 11 : i64} {
  func.func @_ffn_block_kernel(%arg0: i32, %arg1: memref<1x8x32xf32, #tpu.memory_space<vmem>>, %arg2: memref<32x64xf32, #tpu.memory_space<vmem>>, %arg3: memref<1x64xf32, #tpu.memory_space<vmem>>, %arg4: memref<64x32xf32, #tpu.memory_space<vmem>>, %arg5: memref<1x32xf32, #tpu.memory_space<vmem>>, %arg6: memref<1x32xf32, #tpu.memory_space<vmem>>, %arg7: memref<1x32xf32, #tpu.memory_space<vmem>>, %arg8: memref<1x8x32xf32, #tpu.memory_space<vmem>>) attributes {dimension_semantics = [#tpu.dimension_semantics<parallel>], iteration_bounds = array<i64: 2>, scalar_prefetch = 0 : i64, scratch_operands = 0 : i64, tpu.core_type = #tpu.core_type<tc>, window_params = [{transform_indices = @transform_0, window_bounds = array<i64: 1, 8, 32>}, {pipeline_mode = #tpu.pipeline_mode<synchronous>, transform_indices = @transform_1, window_bounds = array<i64: 32, 64>}, {pipeline_mode = #tpu.pipeline_mode<synchronous>, transform_indices = @transform_2, window_bounds = array<i64: 1, 64>}, {pipeline_mode = #tpu.pipeline_mode<synchronous>, transform_indices = @transform_3, window_bounds = array<i64: 64, 32>}, {pipeline_mode = #tpu.pipeline_mode<synchronous>, transform_indices = @transform_4, window_bounds = array<i64: 1, 32>}, {pipeline_mode = #tpu.pipeline_mode<synchronous>, transform_indices = @transform_5, window_bounds = array<i64: 1, 32>}, {pipeline_mode = #tpu.pipeline_mode<synchronous>, transform_indices = @transform_6, window_bounds = array<i64: 1, 32>}, {transform_indices = @transform_7, window_bounds = array<i64: 1, 8, 32>}]} {
    %c0 = arith.constant 0 : index
    %c0_0 = arith.constant 0 : index
    %c0_1 = arith.constant 0 : index
    %0 = vector.load %arg1[%c0, %c0_0, %c0_1] : memref<1x8x32xf32, #tpu.memory_space<vmem>>, vector<1x8x32xf32>
    %1 = vector.shape_cast %0 : vector<1x8x32xf32> to vector<8x32xf32>
    %c0_2 = arith.constant 0 : index
    %c0_3 = arith.constant 0 : index
    %2 = vector.load %arg2[%c0_2, %c0_3] : memref<32x64xf32, #tpu.memory_space<vmem>>, vector<32x64xf32>
    %cst = arith.constant dense<0.000000e+00> : vector<8x64xf32>
    %3 = tpu.matmul %1, %2, %cst {dimension_numbers = #tpu.dot_dimension_numbers<[1], [0], [0], [1], [0, 0, 1, 1], [], []>} : vector<8x32xf32>, vector<32x64xf32>, vector<8x64xf32> -> vector<8x64xf32>
    %c0_4 = arith.constant 0 : index
    %c0_5 = arith.constant 0 : index
    %4 = vector.load %arg3[%c0_4, %c0_5] : memref<1x64xf32, #tpu.memory_space<vmem>>, vector<1x64xf32>
    %5 = vector.broadcast %4 : vector<1x64xf32> to vector<8x64xf32>
    %6 = arith.addf %3, %5 : vector<8x64xf32>
    %cst_6 = arith.constant 0.000000e+00 : f32
    %7 = vector.broadcast %cst_6 : f32 to vector<8x64xf32>
    %8 = arith.maximumf %6, %7 : vector<8x64xf32>
    %c0_7 = arith.constant 0 : index
    %c0_8 = arith.constant 0 : index
    %9 = vector.load %arg4[%c0_7, %c0_8] : memref<64x32xf32, #tpu.memory_space<vmem>>, vector<64x32xf32>
    %cst_9 = arith.constant dense<0.000000e+00> : vector<8x32xf32>
    %10 = tpu.matmul %8, %9, %cst_9 {dimension_numbers = #tpu.dot_dimension_numbers<[1], [0], [0], [1], [0, 0, 1, 1], [], []>} : vector<8x64xf32>, vector<64x32xf32>, vector<8x32xf32> -> vector<8x32xf32>
    %c0_10 = arith.constant 0 : index
    %c0_11 = arith.constant 0 : index
    %11 = vector.load %arg5[%c0_10, %c0_11] : memref<1x32xf32, #tpu.memory_space<vmem>>, vector<1x32xf32>
    %12 = vector.broadcast %11 : vector<1x32xf32> to vector<8x32xf32>
    %13 = arith.addf %10, %12 : vector<8x32xf32>
    %14 = arith.addf %1, %13 : vector<8x32xf32>
    %cst_12 = arith.constant dense<0.000000e+00> : vector<8xf32>
    %15 = vector.multi_reduction <add>, %14, %cst_12 [1] : vector<8x32xf32> to vector<8xf32>
    %16 = vector.shape_cast %15 : vector<8xf32> to vector<8x1xf32>
    %cst_13 = arith.constant 3.200000e+01 : f32
    %17 = vector.broadcast %cst_13 : f32 to vector<8x1xf32>
    %18 = arith.divf %16, %17 : vector<8x1xf32>
    %19 = vector.broadcast %18 : vector<8x1xf32> to vector<8x32xf32>
    %20 = arith.subf %14, %19 : vector<8x32xf32>
    %21 = arith.mulf %20, %20 : vector<8x32xf32>
    %cst_14 = arith.constant dense<0.000000e+00> : vector<8xf32>
    %22 = vector.multi_reduction <add>, %21, %cst_14 [1] : vector<8x32xf32> to vector<8xf32>
    %23 = vector.shape_cast %22 : vector<8xf32> to vector<8x1xf32>
    %cst_15 = arith.constant 3.200000e+01 : f32
    %24 = vector.broadcast %cst_15 : f32 to vector<8x1xf32>
    %25 = arith.divf %23, %24 : vector<8x1xf32>
    %cst_16 = arith.constant 9.99999974E-6 : f32
    %26 = vector.broadcast %cst_16 : f32 to vector<8x1xf32>
    %27 = arith.addf %25, %26 : vector<8x1xf32>
    %28 = math.rsqrt %27 : vector<8x1xf32>
    %29 = vector.broadcast %28 : vector<8x1xf32> to vector<8x32xf32>
    %30 = arith.mulf %20, %29 : vector<8x32xf32>
    %c0_17 = arith.constant 0 : index
    %c0_18 = arith.constant 0 : index
    %31 = vector.load %arg6[%c0_17, %c0_18] : memref<1x32xf32, #tpu.memory_space<vmem>>, vector<1x32xf32>
    %32 = vector.broadcast %31 : vector<1x32xf32> to vector<8x32xf32>
    %33 = arith.mulf %30, %32 : vector<8x32xf32>
    %c0_19 = arith.constant 0 : index
    %c0_20 = arith.constant 0 : index
    %34 = vector.load %arg7[%c0_19, %c0_20] : memref<1x32xf32, #tpu.memory_space<vmem>>, vector<1x32xf32>
    %35 = vector.broadcast %34 : vector<1x32xf32> to vector<8x32xf32>
    %36 = arith.addf %33, %35 : vector<8x32xf32>
    %c0_21 = arith.constant 0 : index
    %c0_22 = arith.constant 0 : index
    %c0_23 = arith.constant 0 : index
    %37 = vector.load %arg8[%c0_21, %c0_22, %c0_23] : memref<1x8x32xf32, #tpu.memory_space<vmem>>, vector<1x8x32xf32>
    %38 = vector.shape_cast %37 : vector<1x8x32xf32> to vector<8x32xf32>
    %39 = vector.shape_cast %36 : vector<8x32xf32> to vector<1x8x32xf32>
    tpu.vector_store %arg8[%c0_21, %c0_22, %c0_23], %39 {strides = array<i32>} : memref<1x8x32xf32, #tpu.memory_space<vmem>>, vector<1x8x32xf32>,
    return
  }
  func.func @transform_0(%arg0: i32) -> (i32, i32, i32) {
    %c0_i32 = arith.constant 0 : i32
    %c0_i32_0 = arith.constant 0 : i32
    %c0_i32_1 = arith.constant 0 : i32
    return %arg0, %c0_i32, %c0_i32_0 : i32, i32, i32
  }
  func.func @transform_1(%arg0: i32) -> (i32, i32) {
    %c0_i32 = arith.constant 0 : i32
    %c0_i32_0 = arith.constant 0 : i32
    %c0_i32_1 = arith.constant 0 : i32
    return %c0_i32, %c0_i32_0 : i32, i32
  }
  func.func @transform_2(%arg0: i32) -> (i32, i32) {
    %c0_i32 = arith.constant 0 : i32
    %c0_i32_0 = arith.constant 0 : i32
    %c0_i32_1 = arith.constant 0 : i32
    return %c0_i32, %c0_i32_0 : i32, i32
  }
  func.func @transform_3(%arg0: i32) -> (i32, i32) {
    %c0_i32 = arith.constant 0 : i32
    %c0_i32_0 = arith.constant 0 : i32
    %c0_i32_1 = arith.constant 0 : i32
    return %c0_i32, %c0_i32_0 : i32, i32
  }
  func.func @transform_4(%arg0: i32) -> (i32, i32) {
    %c0_i32 = arith.constant 0 : i32
    %c0_i32_0 = arith.constant 0 : i32
    %c0_i32_1 = arith.constant 0 : i32
    return %c0_i32, %c0_i32_0 : i32, i32
  }
  func.func @transform_5(%arg0: i32) -> (i32, i32) {
    %c0_i32 = arith.constant 0 : i32
    %c0_i32_0 = arith.constant 0 : i32
    %c0_i32_1 = arith.constant 0 : i32
    return %c0_i32, %c0_i32_0 : i32, i32
  }
  func.func @transform_6(%arg0: i32) -> (i32, i32) {
    %c0_i32 = arith.constant 0 : i32
    %c0_i32_0 = arith.constant 0 : i32
    %c0_i32_1 = arith.constant 0 : i32
    return %c0_i32, %c0_i32_0 : i32, i32
  }
  func.func @transform_7(%arg0: i32) -> (i32, i32, i32) {
    %c0_i32 = arith.constant 0 : i32
    %c0_i32_0 = arith.constant 0 : i32
    %c0_i32_1 = arith.constant 0 : i32
    return %arg0, %c0_i32, %c0_i32_0 : i32, i32, i32
  }
}

module attributes {stable_mosaic.version = 11 : i64} {
  func.func @_classifier_kernel(%arg0: memref<2x256xf32, #tpu.memory_space<vmem>>, %arg1: memref<256x128xf32, #tpu.memory_space<vmem>>, %arg2: memref<1x128xf32, #tpu.memory_space<vmem>>, %arg3: memref<2x128xf32, #tpu.memory_space<vmem>>) attributes {dimension_semantics = [], scalar_prefetch = 0 : i64, scratch_operands = 0 : i64, tpu.core_type = #tpu.core_type<tc>} {
    %c0 = arith.constant 0 : index
    %c0_0 = arith.constant 0 : index
    %0 = vector.load %arg0[%c0, %c0_0] : memref<2x256xf32, #tpu.memory_space<vmem>>, vector<2x256xf32>
    %c0_1 = arith.constant 0 : index
    %c0_2 = arith.constant 0 : index
    %1 = vector.load %arg1[%c0_1, %c0_2] : memref<256x128xf32, #tpu.memory_space<vmem>>, vector<256x128xf32>
    %cst = arith.constant dense<0.000000e+00> : vector<2x128xf32>
    %2 = tpu.matmul %0, %1, %cst {dimension_numbers = #tpu.dot_dimension_numbers<[1], [0], [0], [1], [0, 0, 1, 1], [], []>} : vector<2x256xf32>, vector<256x128xf32>, vector<2x128xf32> -> vector<2x128xf32>
    %c0_3 = arith.constant 0 : index
    %c0_4 = arith.constant 0 : index
    %3 = vector.load %arg2[%c0_3, %c0_4] : memref<1x128xf32, #tpu.memory_space<vmem>>, vector<1x128xf32>
    %4 = vector.broadcast %3 : vector<1x128xf32> to vector<2x128xf32>
    %5 = arith.addf %2, %4 : vector<2x128xf32>
    %c0_5 = arith.constant 0 : index
    %c0_6 = arith.constant 0 : index
    %6 = vector.load %arg3[%c0_5, %c0_6] : memref<2x128xf32, #tpu.memory_space<vmem>>, vector<2x128xf32>
    tpu.vector_store %arg3[%c0_5, %c0_6], %5 {strides = array<i32>} : memref<2x128xf32, #tpu.memory_space<vmem>>, vector<2x128xf32>,
    return
  }
}

</mosaic_0001>

<bundles_post_ra>
// kernel: encoder_only_classifier.6
= control target key start
LH: loop header
LB: loop body
LE: loop exit
PB: predicated region body
PF: predicated region fallthrough
CT: control target
= control target key end

     0   :  { %8 = vsyncpa [#allocation3], 0  ;;  %s407_s12 = smov 0   ;;  %s516_s0 = inlined_call_operand.vmem [shape: s32[2,8], index: 0, kind: input, shape index: {}]   ;;  %s517_s1 = inlined_call_operand.vmem [shape: f32[100,1,32], index: 1, kind: input, shape index: {}]   ;;  %s518_s2 = inlined_call_operand.vmem [shape: f32[8,32], index: 2, kind: input, shape index: {}]   ;;  %s519_s3 = inlined_call_operand.vmem [shape: f32[2,8,32], index: 3, kind: output, shape index: {}]  }
   0x1 LB: > { %s413_s13 = sadd.s32 4294967295, %s384_s12   ;;  %p332_p0 = scmp.ge.s32.totalorder %s384_s12, 1  ;;  %s384_s12 = sphi %s407_s12, %s14_s12  }
   0x2   : > { %p108_p1 = scmp.lt.s32.totalorder %s384_s12, 3  ;;  %s121_s16 = sshll.u32 %s516_s0, 4  ;;  %s122_s16 = int_to_ptr.vmem [resolvable:$true] %s121_s16 }
   0x3   : > { %p348_p3 = scmp.eq.s32.totalorder %s413_s13, 0  ;;  %s359_s18 = scalar_lea.vmem %s122_s16, 32 }
   0x4   : > { %p420_p2 = pnand %p332_p0, %p108_p1  ;;  %p360_p6 = scmp.ne.s32.totalorder %s122_s16, %s359_s18 }
   0x5   : > { %p367_p10 = scmp.lt.s32.totalorder %s122_s16, %s122_s16  ;;  %p368_p11 = scmp.lt.s32.totalorder %s359_s18, %s359_s18 }
   0x6   : > { %p344_p4 = pneg %p420_p2 }
   0x7   : > { %p369_p12 = por %p368_p11, %p367_p10 }
   0x8   : > { %p345_p5 = pnand %p348_p3, %p344_p4 }
   0xa   : > { %p361_p7 = pneg %p345_p5 }
   0xc   : > { %p362_p8 = pnand %p361_p7, %p360_p6 }
   0xe   : > { %p363_p9 = pneg %p362_p8 }
  0x10   : > { %p370_p13 = pnand %p369_p12, %p363_p9 }
  0x12   : > { %373 = shalt.err (!%p370_p13)
}
  0x13   : > { %s386_s19 = smov [#allocation2]   ;;  %140 = sbr.rel (%p420_p2) target bundleno = 50 (0x32), region = 32 }
  0x14   : > { %347 = dma.vmem_to_smem (!%p345_p5), %s122_s16, 32, %s386_s19, [#allocation3]  }
  0x18   : > { %379 = dma.done.wait (%p348_p3), [#allocation3], 32  }
  0x19   : > { %381 = vsyncadd (%p348_p3), [#allocation3], 4294967264 }
  0x1a   : > { %146 = sfence }
  0x1b   : > { %s436_s20 = sshll.u32 %s413_s13, 7  ;;  %v212_v0 = vlaneseq  ;;  %p159_p0 = scmp.lt.s32.totalorder %s413_s13, 1  ;;  %v167_v2 = vld [vmem:[%s518_s2] sm:$0x1]  ;;  %v173_v4 = vld [vmem:[%s518_s2 + $0x1] sm:$0x1] }
  0x1c   : > { %s164_s21 = sld [smem:[#allocation2 + %s436_s20]]  ;;  %s169_s22 = sadd.s32 1, %s436_s20  ;;  %v179_v5 = vld [vmem:[%s518_s2 + $0x2] sm:$0x1]  ;;  %v185_v11 = vld [vmem:[%s518_s2 + $0x3] sm:$0x1] }
  0x1d   : > { %s170_s23 = sld [smem:[#allocation2 + %s169_s22]]  ;;  %s175_s24 = sadd.s32 2, %s436_s20  ;;  %v213_v1 = vshrl.u32 %v212_v0, 7  ;;  %v191_v13 = vld [vmem:[%s518_s2 + $0x4] sm:$0x1]  ;;  %vm253_vm0 = vcmask 1040384  }
  0x1e   : > { %s176_s25 = sld [smem:[#allocation2 + %s175_s24]]  ;;  %s181_s26 = sadd.s32 3, %s436_s20  ;;  %vm255_vm1 = vcmask 1041408   ;;  %v197_v18 = vld [vmem:[%s518_s2 + $0x5] sm:$0x1]  ;;  %vm257_vm2 = vcmask 1042432  }
  0x1f   : > { %s182_s27 = sld [smem:[#allocation2 + %s181_s26]]  ;;  %s187_s28 = sadd.s32 4, %s436_s20  ;;  %v214_v6 = vsub.s32 0, %v213_v1  ;;  %v203_v21 = vld [vmem:[%s518_s2 + $0x6] sm:$0x1]  ;;  %vm259_vm3 = vcmask 1043456  }
  0x20   : > { %s188_s7 = sld [smem:[#allocation2 + %s187_s28]]  ;;  %s193_s10 = sadd.s32 5, %s436_s20  ;;  %v209_v28 = vld [vmem:[%s518_s2 + $0x7] sm:$0x1]  ;;  %vm261_vm4 = vcmask 1044480   ;;  %vm263_vm5 = vcmask 1045504  }
  0x21   : > { %s199_s11 = sadd.s32 6, %s436_s20  ;;  %s461_s19 = sld [smem:[#allocation2 + %s193_s10]]  ;;  %vm265_vm6 = vcmask 1046528   ;;  %vm267_vm7 = vcmask 261120  }
  0x22   : > { %s165_s4 = scalar_lea.vmem %s517_s1, %s164_s21  ;;  %s466_s26 = sld [smem:[#allocation2 + %s199_s11]] }
  0x23   : > { %v166_v3 = vld [vmem:[%s165_s4] sm:$0x1]  ;;  %s171_s16 = scalar_lea.vmem %s517_s1, %s170_s23  ;;  %s205_s29 = sadd.s32 7, %s436_s20 }
  0x24   : > { %v172_v7 = vld [vmem:[%s171_s16] sm:$0x1]  ;;  %s177_s24 = scalar_lea.vmem %s517_s1, %s176_s25  ;;  %v168_v8 = vadd.f32 %v167_v2, %v166_v3  ;;  %s478_s8 = sld [smem:[#allocation2 + %s205_s29]] }
  0x25   : > { %v174_v9 = vadd.f32 %v173_v4, %v172_v7  ;;  %v178_v10 = vld [vmem:[%s177_s24] sm:$0x1]  ;;  %s183_s5 = scalar_lea.vmem %s517_s1, %s182_s27  ;;  %s522_s13 = smov (!%p159_p0, %s413_s13), 1 }
  0x26   : > { %v180_v12 = vadd.f32 %v179_v5, %v178_v10  ;;  %v184_v14 = vld [vmem:[%s183_s5] sm:$0x1]  ;;  %s189_s11 = scalar_lea.vmem %s517_s1, %s188_s7  ;;  %s336_s30 = sshll.u32 %s522_s13, 3 }
  0x27   : > { %v215_v15 = vrot.slane %v174_v9, %v214_v6  ;;  %v186_v16 = vadd.f32 %v185_v11, %v184_v14  ;;  %v190_v17 = vld [vmem:[%s189_s11] sm:$0x1]  ;;  %s195_s16 = scalar_lea.vmem %s517_s1, %s461_s19  ;;  %s162_s5 = scalar_lea.vmem %s519_s3, %s336_s30 }
  0x28   : > { %v221_v19 = vrot.slane %v180_v12, %v214_v6  ;;  %v192_v20 = vadd.f32 %v191_v13, %v190_v17  ;;  %v196_v23 = vld [vmem:[%s195_s16] sm:$0x1]  ;;  %s201_s22 = scalar_lea.vmem %s517_s1, %s466_s26 }
  0x29   : > { %v254_v22 = vsel %vm253_vm0, %v168_v8, %v215_v15  ;;  %v227_v24 = vrot.slane %v186_v16, %v214_v6  ;;  %v198_v26 = vadd.f32 %v197_v18, %v196_v23  ;;  %v202_v27 = vld [vmem:[%s201_s22] sm:$0x1] }
  0x2a   : > { %v256_v25 = vsel %vm255_vm1, %v254_v22, %v221_v19  ;;  %v233_v29 = vrot.slane %v192_v20, %v214_v6  ;;  %v204_v30 = vadd.f32 %v203_v21, %v202_v27  ;;  %s207_s29 = scalar_lea.vmem %s517_s1, %s478_s8 }
  0x2b   : > { %v258_v31 = vsel %vm257_vm2, %v256_v25, %v227_v24  ;;  %v208_v32 = vld [vmem:[%s207_s29] sm:$0x1]  ;;  %v239_v33 = vrot.slane %v198_v26, %v214_v6 }
  0x2c   : > { %v260_v34 = vsel %vm259_vm3, %v258_v31, %v233_v29  ;;  %v210_v35 = vadd.f32 %v209_v28, %v208_v32  ;;  %v245_v36 = vrot.slane %v204_v30, %v214_v6 }
  0x2d   : > { %v262_v37 = vsel %vm261_vm4, %v260_v34, %v239_v33 }
  0x2e   : > { %v251_v38 = vrot.slane %v210_v35, %v214_v6  ;;  %v264_v39 = vsel %vm263_vm5, %v262_v37, %v245_v36 }
  0x30   : > { %v266_v40 = vsel %vm265_vm6, %v264_v39, %v251_v38 }
  0x31   : > { %268 = vst.msk [vmem:[%s162_s5] sm:$0xff] %vm267_vm7, %v266_v40 }
  0x32 PF: > { %s14_s12 = sadd.s32 1, %s384_s12  }
  0x33   : > { %p11_p1 = scmp.ge.s32.totalorder %s14_s12, 4  }
  0x35   :  { %13 = sbr.rel (!%p11_p1) target bundleno = 1 (0x1), region = 72 }
  0x3a   :  { %288 = vsyncpa [#allocation3], 1 }
  0x3b   :  { %290 = vsyncpa [#allocation3 + $0x1], 1 }

// kernel: encoder_only_classifier.11
= control target key start
LH: loop header
LB: loop body
LE: loop exit
PB: predicated region body
PF: predicated region fallthrough
CT: control target
= control target key end

     0   :  { %s337_s0 = inlined_call_operand.vmem [shape: f32[2,256], index: 0, kind: input, shape index: {}]   ;;  %s338_s1 = inlined_call_operand.vmem [shape: f32[256,128], index: 1, kind: input, shape index: {}]   ;;  %s339_s2 = inlined_call_operand.vmem [shape: f32[1,128], index: 2, kind: input, shape index: {}]   ;;  %s340_s3 = inlined_call_operand.hbm [shape: f32[2,128], index: 3, kind: output, shape index: {}]  }
   0x1   :  { %v47_v0 = vld [vmem:[%s338_s1 + $0xf8] sm:$0xff]  ;;  %v46_v2 = vld [vmem:[%s338_s1 + $0xf0] sm:$0xff]  ;;  %v45_v4 = vld [vmem:[%s338_s1 + $0xe8] sm:$0xff] }
   0x2   :  { %v31_v1 = vld [vmem:[%s338_s1 + $0x78] sm:$0xff]  ;;  %153 = vmatprep.subr.mxu0 %v47_v0  ;;  %v30_v3 = vld [vmem:[%s338_s1 + $0x70] sm:$0xff]  ;;  %v29_v5 = vld [vmem:[%s338_s1 + $0x68] sm:$0xff] }
   0x3   :  { %154 = vmatpush3.msra.mxu0 %v31_v1  ;;  %v44_v6 = vld [vmem:[%s338_s1 + $0xe0] sm:$0xff]  ;;  %v43_v8 = vld [vmem:[%s338_s1 + $0xd8] sm:$0xff]  ;;  %v42_v10 = vld [vmem:[%s338_s1 + $0xd0] sm:$0xff] }
   0x4   :  { %155 = vmatprep.subr.mxu0 %v46_v2  ;;  %v28_v7 = vld [vmem:[%s338_s1 + $0x60] sm:$0xff]  ;;  %v27_v9 = vld [vmem:[%s338_s1 + $0x58] sm:$0xff]  ;;  %v26_v11 = vld [vmem:[%s338_s1 + $0x50] sm:$0xff] }
   0x5   :  { %156 = vmatpush3.msra.mxu0 %v30_v3  ;;  %v41_v12 = vld [vmem:[%s338_s1 + $0xc8] sm:$0xff]  ;;  %v152_v13 = vld.sshfl [vmem:[%s337_s0] sm:$0x33 pattern:$0x76325410] }
   0x6   :  { %157 = vmatprep.subr.mxu0 %v45_v4  ;;  %v25_v14 = vld [vmem:[%s338_s1 + $0x48] sm:$0xff]  ;;  %v63_v15 = vcombine.high %v152_v13, %v152_v13 }
   0x7   :  { %158 = vmatpush3.msra.mxu0 %v29_v5 }
   0x8   :  { %159 = vmatprep.subr.mxu0 %v44_v6 }
   0x9   :  { %160 = vmatpush3.msra.mxu0 %v28_v7 }
   0xa   :  { %161 = vmatprep.subr.mxu0 %v43_v8 }
   0xb   :  { %162 = vmatpush3.msra.mxu0 %v27_v9 }
   0xc   :  { %163 = vmatprep.subr.mxu0 %v42_v10 }
   0xd   :  { %8 = vsyncpa [#allocation3], 0  ;;  %164 = vmatpush3.msra.mxu0 %v26_v11  ;;  %v40_v16 = vld [vmem:[%s338_s1 + $0xc0] sm:$0xff]  ;;  %130 = vmatprep.mubr.f32.mxu0 %v63_v15  ;;  %v39_v18 = vld [vmem:[%s338_s1 + $0xb8] sm:$0xff]  ;;  %s211_s24 = smov [#allocation2]  }
   0xe   :  { %165 = vmatprep.subr.mxu0 %v41_v12  ;;  %v24_v17 = vld [vmem:[%s338_s1 + $0x40] sm:$0xff]  ;;  %v23_v19 = vld [vmem:[%s338_s1 + $0x38] sm:$0xff]  ;;  %v38_v20 = vld [vmem:[%s338_s1 + $0xb0] sm:$0xff]  ;;  %s143_s25 = sshll.u32 %s211_s24, 4  ;;  %s144_s25 = int_to_ptr.vmem [resolvable:$true] %s143_s25 }
   0xf   :  { %166 = vmatpush3.msra.mxu0 %v25_v14  ;;  %v22_v21 = vld [vmem:[%s338_s1 + $0x30] sm:$0xff]  ;;  %v37_v22 = vld [vmem:[%s338_s1 + $0xa8] sm:$0xff]  ;;  %v36_v24 = vld [vmem:[%s338_s1 + $0xa0] sm:$0xff]  ;;  %s189_s26 = scalar_lea.vmem %s144_s25, 32  ;;  %p194_p1 = scmp.lt.s32.totalorder %s144_s25, %s144_s25 }
  0x10   :  { %167 = vmatprep.subr.mxu0 %v40_v16  ;;  %v21_v23 = vld [vmem:[%s338_s1 + $0x28] sm:$0xff]  ;;  %v20_v25 = vld [vmem:[%s338_s1 + $0x20] sm:$0xff]  ;;  %v35_v26 = vld [vmem:[%s338_s1 + $0x98] sm:$0xff]  ;;  %p190_p0 = scmp.ne.s32.totalorder %s144_s25, %s189_s26  ;;  %p195_p2 = scmp.lt.s32.totalorder %s189_s26, %s189_s26 }
  0x11   :  { %168 = vmatpush3.msra.mxu0 %v24_v17  ;;  %v19_v27 = vld [vmem:[%s338_s1 + $0x18] sm:$0xff]  ;;  %v34_v28 = vld [vmem:[%s338_s1 + $0x90] sm:$0xff]  ;;  %v33_v30 = vld [vmem:[%s338_s1 + $0x88] sm:$0xff] }
  0x12   :  { %169 = vmatprep.subr.mxu0 %v39_v18  ;;  %v18_v29 = vld [vmem:[%s338_s1 + $0x10] sm:$0xff]  ;;  %v17_v31 = vld [vmem:[%s338_s1 + $0x8] sm:$0xff]  ;;  %v32_v32 = vld [vmem:[%s338_s1 + $0x80] sm:$0xff]  ;;  %p196_p3 = por %p195_p2, %p194_p1 }
  0x13   :  { %170 = vmatpush3.msra.mxu0 %v23_v19  ;;  %v16_v33 = vld [vmem:[%s338_s1] sm:$0xff] }
  0x14   :  { %171 = vmatprep.subr.mxu0 %v38_v20  ;;  %v151_v36 = vld [vmem:[%s339_s2] ss:$0 sm:$0xff]  ;;  %p197_p4 = pnand %p196_p3, %p190_p0 }
  0x15   :  { %172 = vmatpush3.msra.mxu0 %v22_v21 }
  0x16   :  { %173 = vmatprep.subr.mxu0 %v37_v22 }
  0x17   :  { %174 = vmatpush3.msra.mxu0 %v21_v23 }
  0x18   :  { %175 = vmatprep.subr.mxu0 %v36_v24 }
  0x19   :  { %176 = vmatpush3.msra.mxu0 %v20_v25 }
  0x1a   :  { %177 = vmatprep.subr.mxu0 %v35_v26 }
  0x1b   :  { %178 = vmatpush3.msra.mxu0 %v19_v27 }
  0x1c   :  { %179 = vmatprep.subr.mxu0 %v34_v28 }
  0x1d   :  { %180 = vmatpush3.msra.mxu0 %v18_v29 }
  0x1e   :  { %181 = vmatprep.subr.mxu0 %v33_v30 }
  0x1f   :  { %182 = vmatpush3.msra.mxu0 %v17_v31 }
  0x20   :  { %183 = vmatprep.subr.mxu0 %v32_v32 }
  0x21   :  { %184 = vmatpush3.msra.mxu0 %v16_v33 }
  0x22   :  { %131 = vmatmul.mubr.f32.vlgmr.msra.gmra.mxu0 %v152_v13 }
  0xe2   :  { %v185_v34 = vpop.f32.mrf.mxu0 }
  0xe4   :  { %v186_v35 = vpop.f32.mrf.mxu0 }
  0xe5   :  { %v187_v37 = vadd.f32 %v186_v35, %v185_v34 }
  0xe7   :  { %v133_v38 = vadd.f32 %v187_v37, %v151_v36 }
  0xe9   :  { %136 = vst [vmem:[#allocation2] sm:$0x3] %v133_v38 }
  0xea   :  { %200 = shalt.err (!%p197_p4)
}
  0xeb   :  { %146 = dma.vmem_to_hbm [thread:$0]  %s144_s25, 32, %s340_s3, [#allocation3]  }
  0xec   :  { %209 = dma.done.wait [#allocation3], 32  }
  0xed   :  { %210 = vsyncadd [#allocation3], 4294967264 }
  0xee   :  { %150 = vsyncpa [#allocation3], 1 }

// kernel: encoder_only_classifier.8
= control target key start
LH: loop header
LB: loop body
LE: loop exit
PB: predicated region body
PF: predicated region fallthrough
CT: control target
= control target key end

     0   :  { %s656_s24 = smov 0   ;;  %s734_s0 = inlined_call_operand.vmem [shape: f32[2,8,32], index: 0, kind: input, shape index: {}]   ;;  %s735_s1 = inlined_call_operand.vmem [shape: f32[32,64], index: 1, kind: input, shape index: {}]   ;;  %s736_s2 = inlined_call_operand.vmem [shape: f32[1,64], index: 2, kind: input, shape index: {}]   ;;  %s737_s3 = inlined_call_operand.vmem [shape: f32[64,32], index: 3, kind: input, shape index: {}]   ;;  %s738_s4 = inlined_call_operand.vmem [shape: f32[1,32], index: 4, kind: input, shape index: {}]   ;;  %s739_s5 = inlined_call_operand.vmem [shape: f32[1,32], index: 5, kind: input, shape index: {}]   ;;  %s740_s6 = inlined_call_operand.vmem [shape: f32[1,32], index: 6, kind: input, shape index: {}]   ;;  %s741_s7 = inlined_call_operand.vmem [shape: f32[2,8,32], index: 7, kind: output, shape index: {}]  }
   0x1 LB: > { %s535_s25 = sadd.s32 4294967295, %s612_s24   ;;  %p539_p0 = scmp.ge.s32.totalorder %s612_s24, 1  ;;  %s612_s24 = sphi %s656_s24, %s17_s24  }
   0x2   : > { %p236_p1 = scmp.lt.s32.totalorder %s612_s24, 3 }
   0x4   : > { %p237_p2 = pnand %p539_p0, %p236_p1 }
   0x5   : > { %p266_p3 = scmp.lt.s32.totalorder (!%p237_p2), %s535_s25, 1 }
   0x6   : > { %240 = sbr.rel (%p237_p2) target bundleno = 723 (0x2d3), region = 48 }
   0xb   : > { %v278_v0 = vld [vmem:[%s735_s1 + $0x18] sm:$0xff]  ;;  %v614_v1 = vmov 0.0   ;;  %v277_v2 = vld [vmem:[%s735_s1 + $0x10] sm:$0xff]  ;;  %vm615_vm0 = vmmov 0   ;;  %s743_s25 = smov (!%p266_p3, %s535_s25), 1  ;;  %v276_v5 = vld [vmem:[%s735_s1 + $0x8] sm:$0xff] }
   0xc   : > { %564 = vmatprep.subr.mxu0 %v614_v1  ;;  %572 = vmatprep.mubr.msk.f32.mxu0 %vm615_vm0, %v614_v1  ;;  %v368_v3 = vld [vmem:[%s737_s3 + $0x38] sm:$0xff]  ;;  %v367_v4 = vld [vmem:[%s737_s3 + $0x30] sm:$0xff]  ;;  %s540_s13 = sshll.u32 %s743_s25, 3  ;;  %v366_v6 = vld [vmem:[%s737_s3 + $0x28] sm:$0xff]  ;;  %vm286_vm1 = vcmask 261120   ;;  %vm376_vm2 = vcmask 523264  }
   0xd   : > { %565 = vmatpush3.msra.mxu0 %v278_v0  ;;  %575 = vmatprep.subr.mxu1 %v614_v1  ;;  %v275_v7 = vld [vmem:[%s735_s1] sm:$0xff]  ;;  %s269_s20 = scalar_lea.vmem %s734_s0, %s540_s13  ;;  %v364_v10 = vld [vmem:[%s737_s3 + $0x18] sm:$0xff]  ;;  %v363_v11 = vld [vmem:[%s737_s3 + $0x10] sm:$0xff]  ;;  %s273_s21 = scalar_lea.vmem %s741_s7, %s540_s13 }
   0xe   : > { %566 = vmatprep.subr.mxu0 %v614_v1  ;;  %576 = vmatpush3.msra.mxu1 %v368_v3  ;;  %v274_v8 = vld [vmem:[%s269_s20] sm:$0xff]  ;;  %v362_v12 = vld [vmem:[%s737_s3 + $0x8] sm:$0xff] }
   0xf   : > { %567 = vmatpush3.msra.mxu0 %v277_v2  ;;  %577 = vmatprep.subr.mxu1 %v614_v1  ;;  %v365_v9 = vld [vmem:[%s737_s3 + $0x20] sm:$0xff] }
  0x10   : > { %568 = vmatprep.subr.mxu0 %v614_v1  ;;  %578 = vmatpush3.msra.mxu1 %v367_v4  ;;  %v361_v13 = vld [vmem:[%s737_s3] sm:$0xff] }
  0x11   : > { %569 = vmatpush3.msra.mxu0 %v276_v5  ;;  %579 = vmatprep.subr.mxu1 %v614_v1  ;;  %v542_v14 = vld [vmem:[%s736_s2] ss:$0 sm:$0xff] }
  0x12   : > { %570 = vmatprep.subr.mxu0 %v614_v1  ;;  %580 = vmatpush3.msra.mxu1 %v366_v6  ;;  %v544_v19 = vld [vmem:[%s738_s4] ss:$0 sm:$0xff] }
  0x13   : > { %571 = vmatpush3.msra.mxu0 %v275_v7  ;;  %581 = vmatprep.subr.mxu1 %v614_v1  ;;  %v546_v34 = vld [vmem:[%s739_s5] ss:$0 sm:$0xff] }
  0x14   : > { %573 = vmatmul.mubr.msk.f32.vlgmr.msra.gmra.mxu0 %vm286_vm1, %v274_v8  ;;  %582 = vmatpush3.msra.mxu1 %v365_v9  ;;  %v547_v36 = vld [vmem:[%s740_s6] ss:$0 sm:$0xff] }
  0x15   : > { %583 = vmatprep.subr.mxu1 %v614_v1  ;;  %591 = vmatprep.mubr.msk.f32.mxu1 %vm615_vm0, %v614_v1 }
  0x16   : > { %584 = vmatpush3.msra.mxu1 %v364_v10 }
  0x17   : > { %585 = vmatprep.subr.mxu1 %v614_v1 }
  0x18   : > { %586 = vmatpush3.msra.mxu1 %v363_v11 }
  0x19   : > { %587 = vmatprep.subr.mxu1 %v614_v1 }
  0x1a   : > { %588 = vmatpush3.msra.mxu1 %v362_v12 }
  0x1b   : > { %589 = vmatprep.subr.mxu1 %v614_v1 }
  0x1c   : > { %590 = vmatpush3.msra.mxu1 %v361_v13 }
  0xd4   : > { %v356_v15 = vpop.f32.mrf.mxu0 }
  0xd5   : > { %v357_v16 = vadd.f32 %v542_v14, %v356_v15 }
  0xd6   : > { %v574_v17 = vpop.f32.mrf.mxu0 }
  0xd7   : > { %v360_v18 = vmax.f32 %v357_v16, 0.0 }
  0xd9   : > { %592 = vmatmul.mubr.msk.f32.vlgmr.msra.gmra.mxu1 %vm376_vm2, %v360_v18 }
 0x199   : > { %v446_v20 = vpop.f32.mrf.mxu1 }
 0x19a   : > { %v447_v21 = vadd.f32 %v544_v19, %v446_v20 }
 0x19b   : > { %v593_v22 = vpop.f32.mrf.mxu1 }
 0x19c   : > { %v450_v23 = vadd.f32 %v447_v21, %v274_v8 }
 0x19e   : > { %v451_v24 = vsel %vm286_vm1, %v450_v23, 0.0 }
 0x19f   : > { %452 = vadd.xlane.f32.xlu0 %v451_v24 }
 0x228   : > { %v453_v25 = vpop.xlane.xlu0 %452 }
 0x229   : > { %v455_v26 = vmul.f32 0.03125, %v453_v25 }
 0x22b   : > { %v456_v27 = vsub.f32 %v450_v23, %v455_v26 }
 0x22d   : > { %v457_v28 = vmul.f32 %v456_v27, %v456_v27 }
 0x22f   : > { %v458_v29 = vsel %vm286_vm1, %v457_v28, 0.0 }
 0x230   : > { %459 = vadd.xlane.f32.xlu0 %v458_v29 }
 0x2b9   : > { %v460_v30 = vpop.xlane.xlu0 %459 }
 0x2ba   : > { %v461_v31 = vmul.f32 0.03125, %v460_v30 }
 0x2bc   : > { %v462_v32 = vadd.f32 1e-05, %v461_v31 }
 0x2be   : > { %604 = vrsqrt.f32 %v462_v32 }
 0x2cb   : > { %v605_v33 = vpop.eup %604 }
 0x2cc   : > { %v464_v35 = vmul.f32 %v605_v33, %v456_v27 }
 0x2ce   : > { %v472_v37 = vmul.f32 %v546_v34, %v464_v35 }
 0x2d0   : > { %v480_v38 = vadd.f32 %v547_v36, %v472_v37 }
 0x2d2   : > { %481 = vst.msk [vmem:[%s273_s21] sm:$0xff] %vm286_vm1, %v480_v38 }
 0x2d3 PF: > { %s17_s24 = sadd.s32 1, %s612_s24  }
 0x2d4   : > { %p14_p4 = scmp.ge.s32.totalorder %s17_s24, 4  }
 0x2d6   :  { %16 = sbr.rel (!%p14_p4) target bundleno = 1 (0x1), region = 78 }

// kernel: encoder_only_classifier.7
= control target key start
LH: loop header
LB: loop body
LE: loop exit
PB: predicated region body
PF: predicated region fallthrough
CT: control target
= control target key end

     0   :  { %s1431_s24 = smov 0   ;;  %s1574_s0 = inlined_call_operand.vmem [shape: f32[2,8,32], index: 0, kind: input, shape index: {}]   ;;  %s1575_s1 = inlined_call_operand.vmem [shape: f32[32,96], index: 1, kind: input, shape index: {}]   ;;  %s1576_s2 = inlined_call_operand.vmem [shape: f32[1,96], index: 2, kind: input, shape index: {}]   ;;  %s1577_s3 = inlined_call_operand.vmem [shape: f32[32,32], index: 3, kind: input, shape index: {}]   ;;  %s1578_s4 = inlined_call_operand.vmem [shape: f32[1,32], index: 4, kind: input, shape index: {}]   ;;  %s1579_s5 = inlined_call_operand.vmem [shape: f32[1,32], index: 5, kind: input, shape index: {}]   ;;  %s1580_s6 = inlined_call_operand.vmem [shape: f32[1,32], index: 6, kind: input, shape index: {}]   ;;  %s1581_s7 = inlined_call_operand.vmem [shape: f32[2,8,32], index: 7, kind: output, shape index: {}]  }
   0x1 LB: > { %s1210_s25 = sadd.s32 4294967295, %s1373_s24   ;;  %p1214_p0 = scmp.ge.s32.totalorder %s1373_s24, 1  ;;  %s1373_s24 = sphi %s1431_s24, %s17_s24  }
   0x2   : > { %p236_p1 = scmp.lt.s32.totalorder %s1373_s24, 3 }
   0x4   : > { %p237_p2 = pnand %p1214_p0, %p236_p1 }
   0x5   : > { %p266_p3 = scmp.lt.s32.totalorder (!%p237_p2), %s1210_s25, 1  ;;  %s1377_s17 = smov (!%p237_p2), 64  }
   0x6   : > { %240 = sbr.rel (%p237_p2) target bundleno = 2211 (0x8a3), region = 48  ;;  %s1378_s18 = smov (!%p237_p2), 96  }
   0x7   : > { %s1379_s19 = smov (!%p237_p2), 88   ;;  %s1380_s20 = smov (!%p237_p2), 120  }
   0x8   : > { %s1381_s21 = smov (!%p237_p2), 80   ;;  %s1382_s22 = smov (!%p237_p2), 72  }
   0x9   : > { %s1383_s23 = smov (!%p237_p2), 112   ;;  %s1384_s26 = smov (!%p237_p2), 104  }
   0xa   : > { %s1385_s27 = smov (!%p237_p2), 56   ;;  %s1386_s28 = smov (!%p237_p2), 48  }
   0xb   : > { %v278_v0 = vld [vmem:[%s1575_s1 + $0x18] sm:$0xff]  ;;  %v1375_v1 = vmov 0.0   ;;  %v277_v2 = vld [vmem:[%s1575_s1 + $0x10] sm:$0xff]  ;;  %vm1376_vm0 = vmmov 0   ;;  %s1583_s25 = smov (!%p266_p3, %s1210_s25), 1  ;;  %v276_v3 = vld [vmem:[%s1575_s1 + $0x8] sm:$0xff] }
   0xc   : > { %1263 = vmatprep.subr.mxu0 %v1375_v1  ;;  %1271 = vmatprep.mubr.msk.f32.mxu0 %vm1376_vm0, %v1375_v1  ;;  %s1215_s9 = sshll.u32 %s1583_s25, 3  ;;  %v275_v4 = vld [vmem:[%s1575_s1] sm:$0xff]  ;;  %vm286_vm1 = vcmask 261120   ;;  %vm363_vm2 = vcmask 64512   ;;  %s1387_s29 = smov 40   ;;  %vm1037_vm3 = vcmask 130048  }
   0xd   : > { %1264 = vmatpush3.msra.mxu0 %v278_v0  ;;  %1274 = vmatprep.subr.mxu1 %v1375_v1  ;;  %s269_s14 = scalar_lea.vmem %s1574_s0, %s1215_s9  ;;  %v1217_v6 = vld [vmem:[%s1576_s2] ss:$0 sm:$0xff]  ;;  %s1388_s16 = smov 8   ;;  %vm1039_vm4 = vcmask 195584  }
   0xe   : > { %1265 = vmatprep.subr.mxu0 %v1375_v1  ;;  %1276 = vmatprep.mubr.msk.f32.mxu1 %vm1376_vm0, %v1375_v1  ;;  %v1467_v5 = vld [vmem:[%s269_s14] sm:$0xff] }
   0xf   : > { %1266 = vmatpush3.msra.mxu0 %v277_v2 }
  0x10   : > { %1267 = vmatprep.subr.mxu0 %v1375_v1 }
  0x11   : > { %1268 = vmatpush3.msra.mxu0 %v276_v3 }
  0x12   : > { %1269 = vmatprep.subr.mxu0 %v1375_v1 }
  0x13   : > { %1270 = vmatpush3.msra.mxu0 %v275_v4 }
  0x14   : > { %1272 = vmatmul.mubr.msk.f32.vlgmr.msra.gmra.mxu0 %vm286_vm1, %v1467_v5  ;;  %1294 = vmatprep.subr.mxu0 %v1375_v1 }
  0x15   : > { %1296 = vmatprep.mubr.msk.f32.mxu0 %vm1376_vm0, %v1375_v1 }
  0xd4   : > { %v356_v7 = vpop.f32.mrf.mxu0 }
  0xd5   : > { %v1478_v8 = vadd.f32 %v1217_v6, %v356_v7 }
  0xd6   : > { %v1273_v9 = vpop.f32.mrf.mxu0 }
  0xd7   : > { %450 = vrot.lane.b32.xlu1 %v1478_v8, %s1377_s17  ;;  %361 = vrot.lane.b32.xlu0 %v1478_v8, %s1378_s18  ;;  %v1044_v9 = vld [vmem:[%s1577_s3 + $0x18] sm:$0xff]  ;;  %s1389_s17 = smov 16   ;;  %s1390_s18 = smov 24  }
  0xdb   : > { %528 = vrot.lane.b32.xlu1 %v1478_v8, %s1379_s19 }
  0xdf   : > { %526 = vrot.lane.b32.xlu1 %v1478_v8, %s1380_s20 }
  0xe3   : > { %694 = vrot.lane.b32.xlu1 %v1478_v8, %s1381_s21 }
 0x149   : > { %v451_v10 = vpop.permute.xlu1 %450  ;;  %v362_v11 = vpop.permute.xlu0 %361 }
 0x14a   : > { %1275 = vmatpush3.xpose.msk.msra.mxu1 %vm363_vm2, %v362_v11  ;;  %v1042_v11 = vld [vmem:[%s1577_s3 + $0x8] sm:$0xff] }
 0x14b   : > { %1279 = vmatprep.subr.mxu1 %v1375_v1 }
 0x14d   : > { %v529_v12 = vpop.permute.xlu1 %528  ;;  %1277 = vmatmul.mubr.msk.f32.vlgmr.msra.gmra.mxu1 %vm363_vm2, %v1478_v8 }
 0x14e   : > { %1280 = vmatpush3.msra.mxu1 %v451_v10  ;;  %1281 = vmatprep.mubr.msk.f32.mxu1 %vm1376_vm0, %v1375_v1  ;;  %v1043_v10 = vld [vmem:[%s1577_s3 + $0x10] sm:$0xff] }
 0x14f   : > { %1284 = vmatprep.subr.mxu1 %v1375_v1 }
 0x151   : > { %v527_v13 = vpop.permute.xlu1 %526 }
 0x155   : > { %v695_v14 = vpop.permute.xlu1 %694 }
 0x156   : > { %1295 = vmatpush3.xpose.msk.msra.mxu0 %vm363_vm2, %v695_v14 }
 0x157   : > { %1304 = vmatprep.subr.mxu0 %v1375_v1 }
 0x20d   : > { %v434_v15 = vpop.f32.mrf.mxu1 }
 0x20e   : > { %v438_v16 = vmul.f32 0.35355338, %v434_v15 }
 0x20f   : > { %v1278_v17 = vpop.f32.mrf.mxu1 }
 0x210   : > { %v439_v18 = vsel %vm363_vm2, %v438_v16, -inf }
 0x211   : > { %440 = vmax.xlane.f32.xlu0 %v439_v18 }
 0x227   : > { %860 = vrot.lane.b32.xlu0 %v1478_v8, %s1382_s22 }
 0x29a   : > { %v441_v19 = vpop.xlane.xlu0 %440 }
 0x29b   : > { %v442_v20 = vsub.f32 %v438_v16, %v441_v19 }
 0x29d   : > { %v443_v21 = vmul.f32 1.442695, %v442_v20 }
 0x29e   : > { %v861_v26 = vpop.permute.xlu0 %860 }
 0x29f   : > { %1349 = vpow2.f32 %v443_v21 }
 0x2ac   : > { %v1350_v22 = vpop.eup %1349 }
 0x2ad   : > { %v445_v23 = vsel %vm363_vm2, %v1350_v22, 0.0 }
 0x2ae   : > { %446 = vadd.xlane.f32.xlu1 %v445_v23 }
 0x2bf   : > { %692 = vrot.lane.b32.xlu1 %v1478_v8, %s1383_s23 }
 0x2c3   : > { %858 = vrot.lane.b32.xlu1 %v1478_v8, %s1384_s26 }
 0x337   : > { %v447_v24 = vpop.xlane.xlu1 %446 }
 0x338   : > { %1351 = vrcp.f32 %v447_v24  ;;  %v1231_v24 = vld [vmem:[%s1578_s4] ss:$0 sm:$0xff] }
 0x33b   : > { %v693_v25 = vpop.permute.xlu1 %692 }
 0x33c   : > { %1297 = vmatmul.mubr.msk.f32.vlgmr.msra.gmra.mxu0 %vm363_vm2, %v693_v25 }
 0x33d   : > { %1305 = vmatpush3.xpose.msk.msra.mxu0 %vm363_vm2, %v861_v26  ;;  %1306 = vmatprep.mubr.msk.f32.mxu0 %vm1376_vm0, %v1375_v1 }
 0x33e   : > { %1314 = vmatprep.subr.mxu0 %v1375_v1 }
 0x33f   : > { %v859_v27 = vpop.permute.xlu1 %858 }
 0x340   : > { %1307 = vmatmul.mubr.msk.f32.vlgmr.msra.gmra.mxu0 %vm363_vm2, %v859_v27 }
 0x341   : > { %1322 = vmatprep.mubr.msk.f32.mxu0 %vm1376_vm0, %v1375_v1  ;;  %1315 = vmatpush3.msra.mxu0 %v1044_v9 }
 0x342   : > { %1316 = vmatprep.subr.mxu0 %v1375_v1 }
 0x343   : > { %1317 = vmatpush3.msra.mxu0 %v1043_v10 }
 0x344   : > { %1318 = vmatprep.subr.mxu0 %v1375_v1 }
 0x345   : > { %v1352_v28 = vpop.eup %1351  ;;  %1319 = vmatpush3.msra.mxu0 %v1042_v11 }
 0x346   : > { %v449_v29 = vmul.f32 %v1352_v28, %v1350_v22  ;;  %1320 = vmatprep.subr.mxu0 %v1375_v1 }
 0x348   : > { %1282 = vmatmul.mubr.msk.f32.vlgmr.msra.gmra.mxu1 %vm363_vm2, %v449_v29 }
 0x349   : > { %1285 = vmatpush3.xpose.msk.msra.mxu1 %vm363_vm2, %v529_v12  ;;  %1286 = vmatprep.mubr.msk.f32.mxu1 %vm1376_vm0, %v1375_v1  ;;  %v1041_v12 = vld [vmem:[%s1577_s3] sm:$0xff] }
 0x34a   : > { %1289 = vmatprep.subr.mxu1 %v1375_v1  ;;  %1321 = vmatpush3.msra.mxu0 %v1041_v12 }
 0x34c   : > { %1287 = vmatmul.mubr.msk.f32.vlgmr.msra.gmra.mxu1 %vm363_vm2, %v527_v13 }
 0x34d   : > { %1291 = vmatprep.mubr.msk.f32.mxu1 %vm1376_vm0, %v1375_v1 }
 0x3fc   : > { %v766_v30 = vpop.f32.mrf.mxu0 }
 0x3fd   : > { %v770_v31 = vmul.f32 0.35355338, %v766_v30 }
 0x3fe   : > { %v1298_v32 = vpop.f32.mrf.mxu0 }
 0x3ff   : > { %v771_v33 = vsel %vm363_vm2, %v770_v31, -inf }
 0x400   : > { %772 = vmax.xlane.f32.xlu0 %v771_v33  ;;  %v932_v34 = vpop.f32.mrf.mxu0 }
 0x401   : > { %v936_v41 = vmul.f32 0.35355338, %v932_v34 }
 0x402   : > { %v1308_v35 = vpop.f32.mrf.mxu0 }
 0x403   : > { %v937_v43 = vsel %vm363_vm2, %v936_v41, -inf }
 0x408   : > { %v1516_v36 = vpop.f32.mrf.mxu1 }
 0x40a   : > { %v1283_v37 = vpop.f32.mrf.mxu1 }
 0x40c   : > { %v600_v38 = vpop.f32.mrf.mxu1 }
 0x40d   : > { %v604_v39 = vmul.f32 0.35355338, %v600_v38 }
 0x40e   : > { %v1288_v40 = vpop.f32.mrf.mxu1 }
 0x40f   : > { %v605_v42 = vsel %vm363_vm2, %v604_v39, -inf  ;;  %v1234_v40 = vld [vmem:[%s1580_s6] ss:$0 sm:$0xff] }
 0x410   : > { %606 = vmax.xlane.f32.xlu1 %v605_v42 }
 0x414   : > { %938 = vmax.xlane.f32.xlu1 %v937_v43 }
 0x489   : > { %v773_v44 = vpop.xlane.xlu0 %772 }
 0x48a   : > { %v774_v45 = vsub.f32 %v770_v31, %v773_v44 }
 0x48c   : > { %v775_v46 = vmul.f32 1.442695, %v774_v45 }
 0x48e   : > { %1353 = vpow2.f32 %v775_v46 }
 0x499   : > { %v607_v47 = vpop.xlane.xlu1 %606 }
 0x49a   : > { %v608_v55 = vsub.f32 %v604_v39, %v607_v47 }
 0x49b   : > { %v1354_v48 = vpop.eup %1353 }
 0x49c   : > { %v777_v49 = vsel %vm363_vm2, %v1354_v48, 0.0  ;;  %v609_v56 = vmul.f32 1.442695, %v608_v55 }
 0x49d   : > { %778 = vadd.xlane.f32.xlu1 %v777_v49  ;;  %v939_v50 = vpop.xlane.xlu1 %938 }
 0x49e   : > { %v940_v51 = vsub.f32 %v936_v41, %v939_v50 }
 0x4a0   : > { %v941_v52 = vmul.f32 1.442695, %v940_v51 }
 0x4a2   : > { %1355 = vpow2.f32 %v941_v52 }
 0x4a3   : > { %1357 = vpow2.f32 %v609_v56 }
 0x4ae   : > { %616 = vrot.lane.b32.xlu1 %v1478_v8, %s1385_s27 }
 0x4af   : > { %v1356_v53 = vpop.eup %1355 }
 0x4b0   : > { %v943_v54 = vsel %vm363_vm2, %v1356_v53, 0.0  ;;  %v1358_v57 = vpop.eup %1357 }
 0x4b1   : > { %944 = vadd.xlane.f32.xlu0 %v943_v54  ;;  %v611_v58 = vsel %vm363_vm2, %v1358_v57, 0.0 }
 0x4c7   : > { %782 = vrot.lane.b32.xlu0 %v1478_v8, %s1386_s28 }
 0x4d2   : > { %612 = vadd.xlane.f32.xlu1 %v611_v58 }
 0x4e3   : > { %948 = vrot.lane.b32.xlu1 %v1478_v8, %s1387_s29  ;;  %s273_s29 = scalar_lea.vmem %s1581_s7, %s1215_s9 }
 0x526   : > { %v779_v59 = vpop.xlane.xlu1 %778 }
 0x52a   : > { %v617_v60 = vpop.permute.xlu1 %616 }
 0x52b   : > { %1290 = vmatpush3.msra.mxu1 %v617_v60 }
 0x52c   : > { %1299 = vmatprep.subr.mxu1 %v1375_v1 }
 0x53a   : > { %v945_v62 = vpop.xlane.xlu0 %944 }
 0x53e   : > { %v783_v3 = vpop.permute.xlu0 %782 }
 0x55b   : > { %v613_v61 = vpop.xlane.xlu1 %612 }
 0x55c   : > { %1359 = vrcp.f32 %v613_v61 }
 0x55d   : > { %1361 = vrcp.f32 %v779_v59 }
 0x55e   : > { %1363 = vrcp.f32 %v945_v62 }
 0x55f   : > { %v949_v7 = vpop.permute.xlu1 %948 }
 0x569   : > { %v1360_v63 = vpop.eup %1359 }
 0x56a   : > { %v615_v0 = vmul.f32 %v1360_v63, %v1358_v57  ;;  %v1362_v2 = vpop.eup %1361 }
 0x56b   : > { %v781_v4 = vmul.f32 %v1362_v2, %v1354_v48  ;;  %v1364_v6 = vpop.eup %1363 }
 0x56c   : > { %1292 = vmatmul.mubr.msk.f32.vlgmr.msra.gmra.mxu1 %vm363_vm2, %v615_v0  ;;  %v947_v8 = vmul.f32 %v1364_v6, %v1356_v53 }
 0x56d   : > { %1300 = vmatpush3.msra.mxu1 %v783_v3  ;;  %1301 = vmatprep.mubr.msk.f32.mxu1 %vm1376_vm0, %v1375_v1 }
 0x56e   : > { %1309 = vmatprep.subr.mxu1 %v1375_v1 }
 0x570   : > { %1302 = vmatmul.mubr.msk.f32.vlgmr.msra.gmra.mxu1 %vm363_vm2, %v781_v4 }
 0x571   : > { %1310 = vmatpush3.msra.mxu1 %v949_v7  ;;  %1311 = vmatprep.mubr.msk.f32.mxu1 %vm1376_vm0, %v1375_v1 }
 0x574   : > { %1312 = vmatmul.mubr.msk.f32.vlgmr.msra.gmra.mxu1 %vm363_vm2, %v947_v8 }
 0x62c   : > { %v688_v13 = vpop.f32.mrf.mxu1 }
 0x62d   : > { %1025 = vrot.lane.b32.xlu1 %v688_v13, %s1388_s16 }
 0x62e   : > { %v1293_v14 = vpop.f32.mrf.mxu1 }
 0x630   : > { %v854_v15 = vpop.f32.mrf.mxu1 }
 0x631   : > { %1029 = vrot.lane.b32.xlu0 %v854_v15, %s1389_s17 }
 0x632   : > { %v1303_v16 = vpop.f32.mrf.mxu1 }
 0x634   : > { %v1020_v17 = vpop.f32.mrf.mxu1 }
 0x635   : > { %1033 = vrot.lane.b32.xlu1 %v1020_v17, %s1390_s18 }
 0x636   : > { %v1313_v18 = vpop.f32.mrf.mxu1 }
 0x69f   : > { %v1026_v19 = vpop.permute.xlu1 %1025 }
 0x6a0   : > { %v1036_v20 = vsel %vm363_vm2, %v1516_v36, %v1026_v19 }
 0x6a3   : > { %v1030_v1 = vpop.permute.xlu0 %1029 }
 0x6a4   : > { %v1038_v21 = vsel %vm1037_vm3, %v1036_v20, %v1030_v1 }
 0x6a7   : > { %v1034_v22 = vpop.permute.xlu1 %1033 }
 0x6a8   : > { %v1040_v23 = vsel %vm1039_vm4, %v1038_v21, %v1034_v22 }
 0x6a9   : > { %1323 = vmatmul.mubr.msk.f32.vlgmr.msra.gmra.mxu0 %vm286_vm1, %v1040_v23 }
 0x769   : > { %v1121_v25 = vpop.f32.mrf.mxu0 }
 0x76a   : > { %v1122_v26 = vadd.f32 %v1231_v24, %v1121_v25 }
 0x76b   : > { %v1324_v27 = vpop.f32.mrf.mxu0 }
 0x76c   : > { %v1125_v28 = vadd.f32 %v1122_v26, %v1467_v5  ;;  %v1233_v5 = vld [vmem:[%s1579_s5] ss:$0 sm:$0xff] }
 0x76e   : > { %v1126_v29 = vsel %vm286_vm1, %v1125_v28, 0.0 }
 0x76f   : > { %1127 = vadd.xlane.f32.xlu0 %v1126_v29 }
 0x7f8   : > { %v1128_v30 = vpop.xlane.xlu0 %1127 }
 0x7f9   : > { %v1130_v31 = vmul.f32 0.03125, %v1128_v30 }
 0x7fb   : > { %v1131_v32 = vsub.f32 %v1125_v28, %v1130_v31 }
 0x7fd   : > { %v1132_v33 = vmul.f32 %v1131_v32, %v1131_v32 }
 0x7ff   : > { %v1133_v34 = vsel %vm286_vm1, %v1132_v33, 0.0 }
 0x800   : > { %1134 = vadd.xlane.f32.xlu1 %v1133_v34 }
 0x889   : > { %v1135_v35 = vpop.xlane.xlu1 %1134 }
 0x88a   : > { %v1136_v36 = vmul.f32 0.03125, %v1135_v35 }
 0x88c   : > { %v1137_v37 = vadd.f32 1e-05, %v1136_v36 }
 0x88e   : > { %1365 = vrsqrt.f32 %v1137_v37 }
 0x89b   : > { %v1366_v38 = vpop.eup %1365 }
 0x89c   : > { %v1139_v39 = vmul.f32 %v1366_v38, %v1131_v32 }
 0x89e   : > { %v1147_v41 = vmul.f32 %v1233_v5, %v1139_v39 }
 0x8a0   : > { %v1155_v42 = vadd.f32 %v1234_v40, %v1147_v41 }
 0x8a2   : > { %1156 = vst.msk [vmem:[%s273_s29] sm:$0xff] %vm286_vm1, %v1155_v42 }
 0x8a3 PF: > { %s17_s24 = sadd.s32 1, %s1373_s24  }
 0x8a4   : > { %p14_p4 = scmp.ge.s32.totalorder %s17_s24, 4  }
 0x8a6   :  { %16 = sbr.rel (!%p14_p4) target bundleno = 1 (0x1), region = 78 }

</bundles_post_ra>
